<compile_context>
chip_gen: v6e
topology: v6e:2x2x1
jax: 0.10.0
libtpu: 0.0.40
codegen_flags: <defaults>
</compile_context>

<pallas_src>
import functools

import jax
import jax.numpy as jnp
from jax.experimental import pallas as pl
from jax.experimental.pallas import tpu as pltpu


# MXU input dtype for the im2col matmuls.  float32 keeps exact parity with the
# f32 PyTorch module; switch to jnp.bfloat16 for ~2x MXU throughput at larger
# (N, L) once a looser numerical tolerance is acceptable.
_MXU_DTYPE = jnp.float32

# (kernel_size, padding) of the three conv layers, fixed by the module.
_CONV_CFG = ((8, 4), (5, 2), (3, 1))


# ----------------------------------------------------------------------------
# Fused Pallas kernel
# ----------------------------------------------------------------------------
def _conv_bn_relu(pad_ref, x, w_ref, scale, bias, *, ksz, pad, l_out, use_mxu):
    """One Conv1d('same') + folded-BN + ReLU on a VMEM-resident activation.

    pad_ref : VMEM scratch (l_out + 2*pad, c_in) used to build the padded input
    x       : (l_out, c_in) f32 activation (value, already in vregs)
    w_ref   : (ksz, 1, c_out) when not use_mxu, else (ksz*c_in, c_out)
    scale   : (1, c_out) folded BN scale
    bias    : (1, c_out) folded (conv bias + BN) bias
    """
    # In-kernel "same" padding: zero the halo buffer, store the interior.
    pad_ref[...] = jnp.zeros_like(pad_ref)
    pad_ref[pad:pad + l_out, :] = x

    if not use_mxu:
        # c_in == 1: VPU broadcast multiply-accumulate over the K taps.
        c_out = w_ref.shape[-1]
        acc = jnp.zeros((l_out, c_out), jnp.float32)
        for k in range(ksz):                                   # static unroll
            acc = acc + pad_ref[k:k + l_out, :] * w_ref[k]     # (L,1)*(1,C)
    else:
        # im2col: (l_out, ksz*c_in) columns, then a single fat MXU matmul.
        # Chunk widths are multiples of 128, so the lane concat is aligned.
        cols = jnp.concatenate(
            [pad_ref[k:k + l_out, :] for k in range(ksz)], axis=-1)
        acc = jnp.dot(cols.astype(_MXU_DTYPE), w_ref[...].astype(_MXU_DTYPE),
                      preferred_element_type=jnp.float32)

    return jnp.maximum(acc * scale + bias, 0.0)                # BN affine + ReLU


def _fcnmrm2_fused_kernel(x_ref, w1_ref, s1_ref, b1_ref,
                          w2_ref, s2_ref, b2_ref,
                          w3_ref, s3_ref, b3_ref,
                          emb_ref, pad1_ref, pad2_ref, pad3_ref, *, l_out):
    (k1, p1), (k2, p2), (k3, p3) = _CONV_CFG

    # layer1: K=8, pad=4 yields L+1 valid outputs; the module drops the last
    # (x[:, :, :-1]), so only output positions 0..L-1 are evaluated.
    h1 = _conv_bn_relu(pad1_ref, x_ref[0], w1_ref, s1_ref[...], b1_ref[...],
                       ksz=k1, pad=p1, l_out=l_out, use_mxu=False)
    # layer2 / layer3: 'same' conv via im2col + single MXU matmul, all in VMEM.
    h2 = _conv_bn_relu(pad2_ref, h1, w2_ref, s2_ref[...], b2_ref[...],
                       ksz=k2, pad=p2, l_out=l_out, use_mxu=True)
    h3 = _conv_bn_relu(pad3_ref, h2, w3_ref, s3_ref[...], b3_ref[...],
                       ksz=k3, pad=p3, l_out=l_out, use_mxu=True)

    # Global average pool over length; emb is lane-dense (C = 128 lanes).
    emb_ref[0] = jnp.mean(h3, axis=0, keepdims=True).astype(emb_ref.dtype)


# ----------------------------------------------------------------------------
# Pallas wrapper
# ----------------------------------------------------------------------------
def fcnmrm2_fused_embeddings(x_nlc, params):
    """x_nlc: (N, L, C_in) f32 -> emb (N, C) f32, entirely in one pallas_call."""
    n, l, c_in = x_nlc.shape
    (k1, p1), (k2, p2), (k3, p3) = _CONV_CFG

    w1 = params["l1_w"]                                         # (8, c_in, C1)
    c1 = w1.shape[2]
    w2 = params["l2_w"].reshape(k2 * c1, -1)                    # (K2*C1, C2)
    c2 = w2.shape[1]
    w3 = params["l3_w"].reshape(k3 * c2, -1)                    # (K3*C2, C1)
    c3 = w3.shape[1]

    def full(shape):
        return pl.BlockSpec(shape, lambda i, _s=shape: (0,) * len(_s))

    emb3 = pl.pallas_call(
        functools.partial(_fcnmrm2_fused_kernel, l_out=l),
        out_shape=jax.ShapeDtypeStruct((n, 1, c3), jnp.float32),
        grid=(n,),
        in_specs=[
            pl.BlockSpec((1, l, c_in), lambda i: (i, 0, 0)),    # x
            full((k1, c_in, c1)),                               # w1
            full((1, c1)), full((1, c1)),                       # scale1, bias1
            full((k2 * c1, c2)),                                # w2 (im2col form)
            full((1, c2)), full((1, c2)),                       # scale2, bias2
            full((k3 * c2, c3)),                                # w3 (im2col form)
            full((1, c3)), full((1, c3)),                       # scale3, bias3
        ],
        out_specs=pl.BlockSpec((1, 1, c3), lambda i: (i, 0, 0)),
        scratch_shapes=[
            pltpu.VMEM((l + 2 * p1, c_in), jnp.float32),        # layer1 halo buf
            pltpu.VMEM((l + 2 * p2, c1), jnp.float32),          # layer2 halo buf
            pltpu.VMEM((l + 2 * p3, c2), jnp.float32),          # layer3 halo buf
        ],
        compiler_params=pltpu.CompilerParams(
            dimension_semantics=("parallel",)),                 # v7x: 2 TCs
    )(x_nlc, w1, params["l1_scale"], params["l1_bias"],
      w2, params["l2_scale"], params["l2_bias"],
      w3, params["l3_scale"], params["l3_bias"])

    return emb3[:, 0, :]


def fcnmrm2_forward(x_ncl, params):
    """x_ncl: (N, C_in, L) — PyTorch Conv1d layout. labels=None path."""
    x = jnp.transpose(x_ncl, (0, 2, 1)).astype(jnp.float32)     # NCL -> NLC
    emb = fcnmrm2_fused_embeddings(x, params)
    # nb_classes=2 << 128 lanes: keep the tiny head outside Pallas so the
    # kernel's only HBM output (emb) stays lane-dense.
    orig_out = jnp.dot(emb, params["lin_w"],
                       precision=jax.lax.Precision.HIGHEST) + params["lin_b"]
    # TODO(synk): the labels!=None kNN branch uses boolean-mask indexing with
    # data-dependent shapes (x_embeddings[is_train] / [is_test]); no clean
    # static-shape Pallas equivalent, so ttrm2_out is returned as None.
    return {"tcrm2_out": orig_out, "x_embeddings": emb, "ttrm2_out": None}


# ----------------------------------------------------------------------------
# Parameter construction (deterministic, synthetic; BN folded for inference)
# ----------------------------------------------------------------------------
def _fold_bn(conv_bias, gamma, beta, mean, var, eps=1e-5):
    scale = gamma / jnp.sqrt(var + eps)
    bias = (conv_bias - mean) * scale + beta
    return scale[None, :], bias[None, :]


def init_params(key, input_features_d=1, n_feature_maps=128, nb_classes=2):
    ks = jax.random.split(key, 16)
    p = {}

    def conv_block(ki, c_in, c_out, ksz, name):
        w = 0.1 * jax.random.normal(ks[ki], (ksz, c_in, c_out), jnp.float32)
        b = 0.1 * jax.random.normal(ks[ki + 1], (c_out,), jnp.float32)
        gamma = 1.0 + 0.1 * jax.random.normal(ks[ki + 2], (c_out,), jnp.float32)
        beta = 0.1 * jax.random.normal(ks[ki + 3], (c_out,), jnp.float32)
        mean = 0.05 * jax.random.normal(ks[ki], (c_out,), jnp.float32)
        var = 1.0 + 0.1 * jnp.abs(jax.random.normal(ks[ki + 1], (c_out,), jnp.float32))
        scale, bias = _fold_bn(b, gamma, beta, mean, var)
        p[name + "_w"] = w
        p[name + "_scale"] = scale
        p[name + "_bias"] = bias

    conv_block(0, input_features_d, n_feature_maps, 8, "l1")
    conv_block(4, n_feature_maps, 2 * n_feature_maps, 5, "l2")
    conv_block(8, 2 * n_feature_maps, n_feature_maps, 3, "l3")

    p["lin_w"] = 0.1 * jax.random.normal(ks[12], (n_feature_maps, nb_classes), jnp.float32)
    p["lin_b"] = 0.1 * jax.random.normal(ks[13], (nb_classes,), jnp.float32)[None, :]
    return p


# ----------------------------------------------------------------------------
# Pure-JAX reference (independent formulation: jnp.pad + per-tap einsum)
# ----------------------------------------------------------------------------
def _ref_forward(x_ncl, params):
    x = jnp.transpose(x_ncl, (0, 2, 1)).astype(jnp.float32)
    n, L, _ = x.shape
    hi = jax.lax.Precision.HIGHEST

    def conv(xp, w, scale, bias):
        K = w.shape[0]
        acc = sum(jnp.einsum("nlc,cd->nld", xp[:, k:k + L, :], w[k], precision=hi)
                  for k in range(K))
        return jnp.maximum(acc * scale[None] + bias[None], 0.0)

    h = conv(jnp.pad(x, ((0, 0), (4, 4), (0, 0))), params["l1_w"],
             params["l1_scale"], params["l1_bias"])
    h = conv(jnp.pad(h, ((0, 0), (2, 2), (0, 0))), params["l2_w"],
             params["l2_scale"], params["l2_bias"])
    h = conv(jnp.pad(h, ((0, 0), (1, 1), (0, 0))), params["l3_w"],
             params["l3_scale"], params["l3_bias"])
    emb = jnp.mean(h, axis=1)
    out = jnp.dot(emb, params["lin_w"], precision=hi) + params["lin_b"]
    return emb, out


# ----------------------------------------------------------------------------
if __name__ == "__main__":
    key = jax.random.PRNGKey(0)
    k_param, k_x = jax.random.split(key)

    N, C_IN, L = 2, 1, 16
    N_FM, NB_CLASSES = 128, 2          # module default: n_feature_maps=128

    params = init_params(k_param, input_features_d=C_IN,
                         n_feature_maps=N_FM, nb_classes=NB_CLASSES)
    x = jax.random.normal(k_x, (N, C_IN, L), jnp.float32)

    out = jax.jit(lambda xx: fcnmrm2_forward(xx, params))(x)
    jax.block_until_ready(out["tcrm2_out"])
    jax.block_until_ready(out["x_embeddings"])

    ref_emb, ref_out = _ref_forward(x, params)
    assert jnp.allclose(out["x_embeddings"], ref_emb, atol=1e-3, rtol=1e-3), \
        float(jnp.max(jnp.abs(out["x_embeddings"] - ref_emb)))
    assert jnp.allclose(out["tcrm2_out"], ref_out, atol=1e-3, rtol=1e-3), \
        float(jnp.max(jnp.abs(out["tcrm2_out"] - ref_out)))
    assert out["ttrm2_out"] is None

    print("KERNEL_OK")
</pallas_src>

<mosaic_0001>
module attributes {stable_mosaic.version = 11 : i64} {
  func.func @_fcnmrm2_fused_kernel(%arg0: i32, %arg1: memref<1x16x1xf32, #tpu.memory_space<vmem>>, %arg2: memref<8x1x128xf32, #tpu.memory_space<vmem>>, %arg3: memref<1x128xf32, #tpu.memory_space<vmem>>, %arg4: memref<1x128xf32, #tpu.memory_space<vmem>>, %arg5: memref<640x256xf32, #tpu.memory_space<vmem>>, %arg6: memref<1x256xf32, #tpu.memory_space<vmem>>, %arg7: memref<1x256xf32, #tpu.memory_space<vmem>>, %arg8: memref<768x128xf32, #tpu.memory_space<vmem>>, %arg9: memref<1x128xf32, #tpu.memory_space<vmem>>, %arg10: memref<1x128xf32, #tpu.memory_space<vmem>>, %arg11: memref<1x1x128xf32, #tpu.memory_space<vmem>>, %arg12: memref<24x1xf32, #tpu.memory_space<vmem>>, %arg13: memref<20x128xf32, #tpu.memory_space<vmem>>, %arg14: memref<18x256xf32, #tpu.memory_space<vmem>>) attributes {dimension_semantics = [#tpu.dimension_semantics<parallel>], iteration_bounds = array<i64: 2>, scalar_prefetch = 0 : i64, scratch_operands = 3 : i64, tpu.core_type = #tpu.core_type<tc>, window_params = [{transform_indices = @transform_0, window_bounds = array<i64: 1, 16, 1>}, {pipeline_mode = #tpu.pipeline_mode<synchronous>, transform_indices = @transform_1, window_bounds = array<i64: 8, 1, 128>}, {pipeline_mode = #tpu.pipeline_mode<synchronous>, transform_indices = @transform_2, window_bounds = array<i64: 1, 128>}, {pipeline_mode = #tpu.pipeline_mode<synchronous>, transform_indices = @transform_3, window_bounds = array<i64: 1, 128>}, {pipeline_mode = #tpu.pipeline_mode<synchronous>, transform_indices = @transform_4, window_bounds = array<i64: 640, 256>}, {pipeline_mode = #tpu.pipeline_mode<synchronous>, transform_indices = @transform_5, window_bounds = array<i64: 1, 256>}, {pipeline_mode = #tpu.pipeline_mode<synchronous>, transform_indices = @transform_6, window_bounds = array<i64: 1, 256>}, {pipeline_mode = #tpu.pipeline_mode<synchronous>, transform_indices = @transform_7, window_bounds = array<i64: 768, 128>}, {pipeline_mode = #tpu.pipeline_mode<synchronous>, transform_indices = @transform_8, window_bounds = array<i64: 1, 128>}, {pipeline_mode = #tpu.pipeline_mode<synchronous>, transform_indices = @transform_9, window_bounds = array<i64: 1, 128>}, {transform_indices = @transform_10, window_bounds = array<i64: 1, 1, 128>}]} {
    %c0 = arith.constant 0 : index
    %c0_0 = arith.constant 0 : index
    %c0_1 = arith.constant 0 : index
    %0 = vector.load %arg1[%c0, %c0_0, %c0_1] : memref<1x16x1xf32, #tpu.memory_space<vmem>>, vector<1x16x1xf32>
    %1 = vector.shape_cast %0 : vector<1x16x1xf32> to vector<16x1xf32>
    %c0_2 = arith.constant 0 : index
    %c0_3 = arith.constant 0 : index
    %2 = vector.load %arg3[%c0_2, %c0_3] : memref<1x128xf32, #tpu.memory_space<vmem>>, vector<1x128xf32>
    %c0_4 = arith.constant 0 : index
    %c0_5 = arith.constant 0 : index
    %3 = vector.load %arg4[%c0_4, %c0_5] : memref<1x128xf32, #tpu.memory_space<vmem>>, vector<1x128xf32>
    %cst = arith.constant 0.000000e+00 : f32
    %4 = vector.broadcast %cst : f32 to vector<24x1xf32>
    %c0_6 = arith.constant 0 : index
    %c0_7 = arith.constant 0 : index
    %5 = vector.load %arg12[%c0_6, %c0_7] : memref<24x1xf32, #tpu.memory_space<vmem>>, vector<24x1xf32>
    tpu.vector_store %arg12[%c0_6, %c0_7], %4 {strides = array<i32>} : memref<24x1xf32, #tpu.memory_space<vmem>>, vector<24x1xf32>,
    %c4 = arith.constant 4 : index
    %c0_8 = arith.constant 0 : index
    %6 = vector.load %arg12[%c4, %c0_8] : memref<24x1xf32, #tpu.memory_space<vmem>>, vector<16x1xf32>
    tpu.vector_store %arg12[%c4, %c0_8], %1 {strides = array<i32>} : memref<24x1xf32, #tpu.memory_space<vmem>>, vector<16x1xf32>,
    %cst_9 = arith.constant 0.000000e+00 : f32
    %7 = vector.broadcast %cst_9 : f32 to vector<16x128xf32>
    %c0_10 = arith.constant 0 : index
    %c0_11 = arith.constant 0 : index
    %8 = vector.load %arg12[%c0_10, %c0_11] : memref<24x1xf32, #tpu.memory_space<vmem>>, vector<16x1xf32>
    %c0_12 = arith.constant 0 : index
    %c0_13 = arith.constant 0 : index
    %c0_14 = arith.constant 0 : index
    %9 = vector.load %arg2[%c0_12, %c0_13, %c0_14] : memref<8x1x128xf32, #tpu.memory_space<vmem>>, vector<1x1x128xf32>
    %10 = vector.shape_cast %9 : vector<1x1x128xf32> to vector<1x128xf32>
    %11 = vector.broadcast %8 : vector<16x1xf32> to vector<16x128xf32>
    %12 = vector.broadcast %10 : vector<1x128xf32> to vector<16x128xf32>
    %13 = arith.mulf %11, %12 : vector<16x128xf32>
    %14 = arith.addf %7, %13 : vector<16x128xf32>
    %c1 = arith.constant 1 : index
    %c0_15 = arith.constant 0 : index
    %15 = vector.load %arg12[%c1, %c0_15] : memref<24x1xf32, #tpu.memory_space<vmem>>, vector<16x1xf32>
    %c1_16 = arith.constant 1 : index
    %c0_17 = arith.constant 0 : index
    %c0_18 = arith.constant 0 : index
    %16 = vector.load %arg2[%c1_16, %c0_17, %c0_18] : memref<8x1x128xf32, #tpu.memory_space<vmem>>, vector<1x1x128xf32>
    %17 = vector.shape_cast %16 : vector<1x1x128xf32> to vector<1x128xf32>
    %18 = vector.broadcast %15 : vector<16x1xf32> to vector<16x128xf32>
    %19 = vector.broadcast %17 : vector<1x128xf32> to vector<16x128xf32>
    %20 = arith.mulf %18, %19 : vector<16x128xf32>
    %21 = arith.addf %14, %20 : vector<16x128xf32>
    %c2 = arith.constant 2 : index
    %c0_19 = arith.constant 0 : index
    %22 = vector.load %arg12[%c2, %c0_19] : memref<24x1xf32, #tpu.memory_space<vmem>>, vector<16x1xf32>
    %c2_20 = arith.constant 2 : index
    %c0_21 = arith.constant 0 : index
    %c0_22 = arith.constant 0 : index
    %23 = vector.load %arg2[%c2_20, %c0_21, %c0_22] : memref<8x1x128xf32, #tpu.memory_space<vmem>>, vector<1x1x128xf32>
    %24 = vector.shape_cast %23 : vector<1x1x128xf32> to vector<1x128xf32>
    %25 = vector.broadcast %22 : vector<16x1xf32> to vector<16x128xf32>
    %26 = vector.broadcast %24 : vector<1x128xf32> to vector<16x128xf32>
    %27 = arith.mulf %25, %26 : vector<16x128xf32>
    %28 = arith.addf %21, %27 : vector<16x128xf32>
    %c3 = arith.constant 3 : index
    %c0_23 = arith.constant 0 : index
    %29 = vector.load %arg12[%c3, %c0_23] : memref<24x1xf32, #tpu.memory_space<vmem>>, vector<16x1xf32>
    %c3_24 = arith.constant 3 : index
    %c0_25 = arith.constant 0 : index
    %c0_26 = arith.constant 0 : index
    %30 = vector.load %arg2[%c3_24, %c0_25, %c0_26] : memref<8x1x128xf32, #tpu.memory_space<vmem>>, vector<1x1x128xf32>
    %31 = vector.shape_cast %30 : vector<1x1x128xf32> to vector<1x128xf32>
    %32 = vector.broadcast %29 : vector<16x1xf32> to vector<16x128xf32>
    %33 = vector.broadcast %31 : vector<1x128xf32> to vector<16x128xf32>
    %34 = arith.mulf %32, %33 : vector<16x128xf32>
    %35 = arith.addf %28, %34 : vector<16x128xf32>
    %c4_27 = arith.constant 4 : index
    %c0_28 = arith.constant 0 : index
    %36 = vector.load %arg12[%c4_27, %c0_28] : memref<24x1xf32, #tpu.memory_space<vmem>>, vector<16x1xf32>
    %c4_29 = arith.constant 4 : index
    %c0_30 = arith.constant 0 : index
    %c0_31 = arith.constant 0 : index
    %37 = vector.load %arg2[%c4_29, %c0_30, %c0_31] : memref<8x1x128xf32, #tpu.memory_space<vmem>>, vector<1x1x128xf32>
    %38 = vector.shape_cast %37 : vector<1x1x128xf32> to vector<1x128xf32>
    %39 = vector.broadcast %36 : vector<16x1xf32> to vector<16x128xf32>
    %40 = vector.broadcast %38 : vector<1x128xf32> to vector<16x128xf32>
    %41 = arith.mulf %39, %40 : vector<16x128xf32>
    %42 = arith.addf %35, %41 : vector<16x128xf32>
    %c5 = arith.constant 5 : index
    %c0_32 = arith.constant 0 : index
    %43 = vector.load %arg12[%c5, %c0_32] : memref<24x1xf32, #tpu.memory_space<vmem>>, vector<16x1xf32>
    %c5_33 = arith.constant 5 : index
    %c0_34 = arith.constant 0 : index
    %c0_35 = arith.constant 0 : index
    %44 = vector.load %arg2[%c5_33, %c0_34, %c0_35] : memref<8x1x128xf32, #tpu.memory_space<vmem>>, vector<1x1x128xf32>
    %45 = vector.shape_cast %44 : vector<1x1x128xf32> to vector<1x128xf32>
    %46 = vector.broadcast %43 : vector<16x1xf32> to vector<16x128xf32>
    %47 = vector.broadcast %45 : vector<1x128xf32> to vector<16x128xf32>
    %48 = arith.mulf %46, %47 : vector<16x128xf32>
    %49 = arith.addf %42, %48 : vector<16x128xf32>
    %c6 = arith.constant 6 : index
    %c0_36 = arith.constant 0 : index
    %50 = vector.load %arg12[%c6, %c0_36] : memref<24x1xf32, #tpu.memory_space<vmem>>, vector<16x1xf32>
    %c6_37 = arith.constant 6 : index
    %c0_38 = arith.constant 0 : index
    %c0_39 = arith.constant 0 : index
    %51 = vector.load %arg2[%c6_37, %c0_38, %c0_39] : memref<8x1x128xf32, #tpu.memory_space<vmem>>, vector<1x1x128xf32>
    %52 = vector.shape_cast %51 : vector<1x1x128xf32> to vector<1x128xf32>
    %53 = vector.broadcast %50 : vector<16x1xf32> to vector<16x128xf32>
    %54 = vector.broadcast %52 : vector<1x128xf32> to vector<16x128xf32>
    %55 = arith.mulf %53, %54 : vector<16x128xf32>
    %56 = arith.addf %49, %55 : vector<16x128xf32>
    %c7 = arith.constant 7 : index
    %c0_40 = arith.constant 0 : index
    %57 = vector.load %arg12[%c7, %c0_40] : memref<24x1xf32, #tpu.memory_space<vmem>>, vector<16x1xf32>
    %c7_41 = arith.constant 7 : index
    %c0_42 = arith.constant 0 : index
    %c0_43 = arith.constant 0 : index
    %58 = vector.load %arg2[%c7_41, %c0_42, %c0_43] : memref<8x1x128xf32, #tpu.memory_space<vmem>>, vector<1x1x128xf32>
    %59 = vector.shape_cast %58 : vector<1x1x128xf32> to vector<1x128xf32>
    %60 = vector.broadcast %57 : vector<16x1xf32> to vector<16x128xf32>
    %61 = vector.broadcast %59 : vector<1x128xf32> to vector<16x128xf32>
    %62 = arith.mulf %60, %61 : vector<16x128xf32>
    %63 = arith.addf %56, %62 : vector<16x128xf32>
    %64 = vector.broadcast %2 : vector<1x128xf32> to vector<16x128xf32>
    %65 = arith.mulf %63, %64 : vector<16x128xf32>
    %66 = vector.broadcast %3 : vector<1x128xf32> to vector<16x128xf32>
    %67 = arith.addf %65, %66 : vector<16x128xf32>
    %cst_44 = arith.constant 0.000000e+00 : f32
    %68 = vector.broadcast %cst_44 : f32 to vector<16x128xf32>
    %69 = arith.maximumf %67, %68 : vector<16x128xf32>
    %c0_45 = arith.constant 0 : index
    %c0_46 = arith.constant 0 : index
    %70 = vector.load %arg6[%c0_45, %c0_46] : memref<1x256xf32, #tpu.memory_space<vmem>>, vector<1x256xf32>
    %c0_47 = arith.constant 0 : index
    %c0_48 = arith.constant 0 : index
    %71 = vector.load %arg7[%c0_47, %c0_48] : memref<1x256xf32, #tpu.memory_space<vmem>>, vector<1x256xf32>
    %cst_49 = arith.constant 0.000000e+00 : f32
    %72 = vector.broadcast %cst_49 : f32 to vector<20x128xf32>
    %c0_50 = arith.constant 0 : index
    %c0_51 = arith.constant 0 : index
    %73 = vector.load %arg13[%c0_50, %c0_51] : memref<20x128xf32, #tpu.memory_space<vmem>>, vector<20x128xf32>
    tpu.vector_store %arg13[%c0_50, %c0_51], %72 {strides = array<i32>} : memref<20x128xf32, #tpu.memory_space<vmem>>, vector<20x128xf32>,
    %c2_52 = arith.constant 2 : index
    %c0_53 = arith.constant 0 : index
    %74 = vector.load %arg13[%c2_52, %c0_53] : memref<20x128xf32, #tpu.memory_space<vmem>>, vector<16x128xf32>
    tpu.vector_store %arg13[%c2_52, %c0_53], %69 {strides = array<i32>} : memref<20x128xf32, #tpu.memory_space<vmem>>, vector<16x128xf32>,
    %c0_54 = arith.constant 0 : index
    %c0_55 = arith.constant 0 : index
    %75 = vector.load %arg13[%c0_54, %c0_55] : memref<20x128xf32, #tpu.memory_space<vmem>>, vector<16x128xf32>
    %c1_56 = arith.constant 1 : index
    %c0_57 = arith.constant 0 : index
    %76 = vector.load %arg13[%c1_56, %c0_57] : memref<20x128xf32, #tpu.memory_space<vmem>>, vector<16x128xf32>
    %c2_58 = arith.constant 2 : index
    %c0_59 = arith.constant 0 : index
    %77 = vector.load %arg13[%c2_58, %c0_59] : memref<20x128xf32, #tpu.memory_space<vmem>>, vector<16x128xf32>
    %c3_60 = arith.constant 3 : index
    %c0_61 = arith.constant 0 : index
    %78 = vector.load %arg13[%c3_60, %c0_61] : memref<20x128xf32, #tpu.memory_space<vmem>>, vector<16x128xf32>
    %c4_62 = arith.constant 4 : index
    %c0_63 = arith.constant 0 : index
    %79 = vector.load %arg13[%c4_62, %c0_63] : memref<20x128xf32, #tpu.memory_space<vmem>>, vector<16x128xf32>
    %80 = tpu.concatenate %75, %76, %77, %78, %79 in 1 : vector<16x128xf32>, vector<16x128xf32>, vector<16x128xf32>, vector<16x128xf32>, vector<16x128xf32> -> vector<16x640xf32>
    %c0_64 = arith.constant 0 : index
    %c0_65 = arith.constant 0 : index
    %81 = vector.load %arg5[%c0_64, %c0_65] : memref<640x256xf32, #tpu.memory_space<vmem>>, vector<640x256xf32>
    %cst_66 = arith.constant dense<0.000000e+00> : vector<16x256xf32>
    %82 = tpu.matmul %80, %81, %cst_66 {dimension_numbers = #tpu.dot_dimension_numbers<[1], [0], [0], [1], [0, 0, 1, 1], [], []>} : vector<16x640xf32>, vector<640x256xf32>, vector<16x256xf32> -> vector<16x256xf32>
    %83 = vector.broadcast %70 : vector<1x256xf32> to vector<16x256xf32>
    %84 = arith.mulf %82, %83 : vector<16x256xf32>
    %85 = vector.broadcast %71 : vector<1x256xf32> to vector<16x256xf32>
    %86 = arith.addf %84, %85 : vector<16x256xf32>
    %cst_67 = arith.constant 0.000000e+00 : f32
    %87 = vector.broadcast %cst_67 : f32 to vector<16x256xf32>
    %88 = arith.maximumf %86, %87 : vector<16x256xf32>
    %c0_68 = arith.constant 0 : index
    %c0_69 = arith.constant 0 : index
    %89 = vector.load %arg9[%c0_68, %c0_69] : memref<1x128xf32, #tpu.memory_space<vmem>>, vector<1x128xf32>
    %c0_70 = arith.constant 0 : index
    %c0_71 = arith.constant 0 : index
    %90 = vector.load %arg10[%c0_70, %c0_71] : memref<1x128xf32, #tpu.memory_space<vmem>>, vector<1x128xf32>
    %cst_72 = arith.constant 0.000000e+00 : f32
    %91 = vector.broadcast %cst_72 : f32 to vector<18x256xf32>
    %c0_73 = arith.constant 0 : index
    %c0_74 = arith.constant 0 : index
    %92 = vector.load %arg14[%c0_73, %c0_74] : memref<18x256xf32, #tpu.memory_space<vmem>>, vector<18x256xf32>
    tpu.vector_store %arg14[%c0_73, %c0_74], %91 {strides = array<i32>} : memref<18x256xf32, #tpu.memory_space<vmem>>, vector<18x256xf32>,
    %c1_75 = arith.constant 1 : index
    %c0_76 = arith.constant 0 : index
    %93 = vector.load %arg14[%c1_75, %c0_76] : memref<18x256xf32, #tpu.memory_space<vmem>>, vector<16x256xf32>
    tpu.vector_store %arg14[%c1_75, %c0_76], %88 {strides = array<i32>} : memref<18x256xf32, #tpu.memory_space<vmem>>, vector<16x256xf32>,
    %c0_77 = arith.constant 0 : index
    %c0_78 = arith.constant 0 : index
    %94 = vector.load %arg14[%c0_77, %c0_78] : memref<18x256xf32, #tpu.memory_space<vmem>>, vector<16x256xf32>
    %c1_79 = arith.constant 1 : index
    %c0_80 = arith.constant 0 : index
    %95 = vector.load %arg14[%c1_79, %c0_80] : memref<18x256xf32, #tpu.memory_space<vmem>>, vector<16x256xf32>
    %c2_81 = arith.constant 2 : index
    %c0_82 = arith.constant 0 : index
    %96 = vector.load %arg14[%c2_81, %c0_82] : memref<18x256xf32, #tpu.memory_space<vmem>>, vector<16x256xf32>
    %97 = tpu.concatenate %94, %95, %96 in 1 : vector<16x256xf32>, vector<16x256xf32>, vector<16x256xf32> -> vector<16x768xf32>
    %c0_83 = arith.constant 0 : index
    %c0_84 = arith.constant 0 : index
    %98 = vector.load %arg8[%c0_83, %c0_84] : memref<768x128xf32, #tpu.memory_space<vmem>>, vector<768x128xf32>
    %cst_85 = arith.constant dense<0.000000e+00> : vector<16x128xf32>
    %99 = tpu.matmul %97, %98, %cst_85 {dimension_numbers = #tpu.dot_dimension_numbers<[1], [0], [0], [1], [0, 0, 1, 1], [], []>} : vector<16x768xf32>, vector<768x128xf32>, vector<16x128xf32> -> vector<16x128xf32>
    %100 = vector.broadcast %89 : vector<1x128xf32> to vector<16x128xf32>
    %101 = arith.mulf %99, %100 : vector<16x128xf32>
    %102 = vector.broadcast %90 : vector<1x128xf32> to vector<16x128xf32>
    %103 = arith.addf %101, %102 : vector<16x128xf32>
    %cst_86 = arith.constant 0.000000e+00 : f32
    %104 = vector.broadcast %cst_86 : f32 to vector<16x128xf32>
    %105 = arith.maximumf %103, %104 : vector<16x128xf32>
    %cst_87 = arith.constant dense<0.000000e+00> : vector<128xf32>
    %106 = vector.multi_reduction <add>, %105, %cst_87 [0] : vector<16x128xf32> to vector<128xf32>
    %107 = vector.shape_cast %106 : vector<128xf32> to vector<1x128xf32>
    %cst_88 = arith.constant 1.600000e+01 : f32
    %108 = vector.broadcast %cst_88 : f32 to vector<1x128xf32>
    %109 = arith.divf %107, %108 : vector<1x128xf32>
    %c0_89 = arith.constant 0 : index
    %c0_90 = arith.constant 0 : index
    %c0_91 = arith.constant 0 : index
    %110 = vector.load %arg11[%c0_89, %c0_90, %c0_91] : memref<1x1x128xf32, #tpu.memory_space<vmem>>, vector<1x1x128xf32>
    %111 = vector.shape_cast %110 : vector<1x1x128xf32> to vector<1x128xf32>
    %112 = vector.shape_cast %109 : vector<1x128xf32> to vector<1x1x128xf32>
    tpu.vector_store %arg11[%c0_89, %c0_90, %c0_91], %112 {strides = array<i32>} : memref<1x1x128xf32, #tpu.memory_space<vmem>>, vector<1x1x128xf32>,
    return
  }
  func.func @transform_0(%arg0: i32) -> (i32, i32, i32) {
    %c0_i32 = arith.constant 0 : i32
    %c0_i32_0 = arith.constant 0 : i32
    %c0_i32_1 = arith.constant 0 : i32
    return %arg0, %c0_i32, %c0_i32_0 : i32, i32, i32
  }
  func.func @transform_1(%arg0: i32) -> (i32, i32, i32) {
    %c0_i32 = arith.constant 0 : i32
    %c0_i32_0 = arith.constant 0 : i32
    %c0_i32_1 = arith.constant 0 : i32
    %c0_i32_2 = arith.constant 0 : i32
    return %c0_i32, %c0_i32_0, %c0_i32_1 : i32, i32, i32
  }
  func.func @transform_2(%arg0: i32) -> (i32, i32) {
    %c0_i32 = arith.constant 0 : i32
    %c0_i32_0 = arith.constant 0 : i32
    %c0_i32_1 = arith.constant 0 : i32
    return %c0_i32, %c0_i32_0 : i32, i32
  }
  func.func @transform_3(%arg0: i32) -> (i32, i32) {
    %c0_i32 = arith.constant 0 : i32
    %c0_i32_0 = arith.constant 0 : i32
    %c0_i32_1 = arith.constant 0 : i32
    return %c0_i32, %c0_i32_0 : i32, i32
  }
  func.func @transform_4(%arg0: i32) -> (i32, i32) {
    %c0_i32 = arith.constant 0 : i32
    %c0_i32_0 = arith.constant 0 : i32
    %c0_i32_1 = arith.constant 0 : i32
    return %c0_i32, %c0_i32_0 : i32, i32
  }
  func.func @transform_5(%arg0: i32) -> (i32, i32) {
    %c0_i32 = arith.constant 0 : i32
    %c0_i32_0 = arith.constant 0 : i32
    %c0_i32_1 = arith.constant 0 : i32
    return %c0_i32, %c0_i32_0 : i32, i32
  }
  func.func @transform_6(%arg0: i32) -> (i32, i32) {
    %c0_i32 = arith.constant 0 : i32
    %c0_i32_0 = arith.constant 0 : i32
    %c0_i32_1 = arith.constant 0 : i32
    return %c0_i32, %c0_i32_0 : i32, i32
  }
  func.func @transform_7(%arg0: i32) -> (i32, i32) {
    %c0_i32 = arith.constant 0 : i32
    %c0_i32_0 = arith.constant 0 : i32
    %c0_i32_1 = arith.constant 0 : i32
    return %c0_i32, %c0_i32_0 : i32, i32
  }
  func.func @transform_8(%arg0: i32) -> (i32, i32) {
    %c0_i32 = arith.constant 0 : i32
    %c0_i32_0 = arith.constant 0 : i32
    %c0_i32_1 = arith.constant 0 : i32
    return %c0_i32, %c0_i32_0 : i32, i32
  }
  func.func @transform_9(%arg0: i32) -> (i32, i32) {
    %c0_i32 = arith.constant 0 : i32
    %c0_i32_0 = arith.constant 0 : i32
    %c0_i32_1 = arith.constant 0 : i32
    return %c0_i32, %c0_i32_0 : i32, i32
  }
  func.func @transform_10(%arg0: i32) -> (i32, i32, i32) {
    %c0_i32 = arith.constant 0 : i32
    %c0_i32_0 = arith.constant 0 : i32
    %c0_i32_1 = arith.constant 0 : i32
    return %arg0, %c0_i32, %c0_i32_0 : i32, i32, i32
  }
}

</mosaic_0001>

<bundles_post_ra>
// kernel: _lambda_.1
= control target key start
LH: loop header
LB: loop body
LE: loop exit
PB: predicated region body
PF: predicated region fallthrough
CT: control target
= control target key end

     0   :  { %15 = vsyncpa [#allocation6], 0  ;;  %s2012_s0 = inlined_call_operand.vmem [shape: f32[2,16,1], index: 0, kind: input, shape index: {}]   ;;  %s2013_s1 = inlined_call_operand.vmem [shape: f32[8,1,128], index: 1, kind: input, shape index: {}]   ;;  %s2014_s2 = inlined_call_operand.vmem [shape: f32[1,128], index: 2, kind: input, shape index: {}]   ;;  %s2015_s3 = inlined_call_operand.vmem [shape: f32[1,128], index: 3, kind: input, shape index: {}]   ;;  %s2016_s4 = inlined_call_operand.hbm [shape: f32[640,256], index: 4, kind: input, shape index: {}]   ;;  %s2017_s5 = inlined_call_operand.vmem [shape: f32[1,256], index: 5, kind: input, shape index: {}]   ;;  %s2018_s6 = inlined_call_operand.vmem [shape: f32[1,256], index: 6, kind: input, shape index: {}]   ;;  %s2019_s7 = inlined_call_operand.hbm [shape: f32[768,128], index: 7, kind: input, shape index: {}]   ;;  %s2020_s8 = inlined_call_operand.vmem [shape: f32[1,128], index: 8, kind: input, shape index: {}]   ;;  %s2021_s9 = inlined_call_operand.vmem [shape: f32[1,128], index: 9, kind: input, shape index: {}]   ;;  %s2022_s10 = inlined_call_operand.vmem [shape: f32[2,1,128], index: 10, kind: output, shape index: {}]  }
   0x1   :  { %16 = vsyncpa [#allocation8], 0  ;;  %s1863_s13 = smov 0  }
   0x2 LB: > { %s1800_s14 = smov [#allocation5]   ;;  %s1869_s16 = sadd.s32 4294967295, %s1798_s13   ;;  %s1798_s13 = sphi %s1863_s13, %s22_s13  }
   0x3   : > { %s289_s15 = sshll.u32 %s1800_s14, 4  ;;  %p1550_p0 = scmp.ge.s32.totalorder %s1798_s13, 1  ;;  %s290_s15 = int_to_ptr.vmem [resolvable:$true] %s289_s15 }
   0x4   : > { %p268_p1 = scmp.lt.s32.totalorder %s1798_s13, 3  ;;  %p1710_p3 = scmp.eq.s32.totalorder %s1869_s16, 0 }
   0x5   : > { %s1801_s18 = smov [#allocation7]   ;;  %s1743_s21 = scalar_lea.vmem %s290_s15, 20480 }
   0x6   : > { %p1873_p2 = pnand %p1550_p0, %p268_p1  ;;  %s308_s19 = sshll.u32 %s1801_s18, 4  ;;  %s309_s19 = int_to_ptr.vmem [resolvable:$true] %s308_s19 }
   0x7   : > { %p1744_p7 = scmp.ne.s32.totalorder %s290_s15, %s1743_s21  ;;  %p1751_p10 = scmp.lt.s32.totalorder %s290_s15, %s290_s15 }
   0x8   : > { %p1703_p4 = pneg %p1873_p2  ;;  %p1752_p11 = scmp.lt.s32.totalorder %s1743_s21, %s1743_s21 }
   0xa   : > { %p1882_p5 = pnand %p1710_p3, %p1703_p4  ;;  %p1753_p12 = por %p1752_p11, %p1751_p10 }
   0xc   : > { %p1734_p6 = pneg %p1882_p5 }
   0xe   : > { %p1746_p8 = pnand %p1744_p7, %p1734_p6 }
  0x10   : > { %p1747_p9 = pneg %p1746_p8 }
  0x12   : > { %p1754_p13 = pnand %p1753_p12, %p1747_p9 }
  0x14   : > { %1757 = shalt.err (!%p1754_p13)
}
  0x15   : > { %s1802_s22 = smov 256   ;;  %s1803_s23 = smov 16  }
  0x16   : > { %1706 = dma.hbm_to_vmem [thread:$0]  (!%p1882_p5), %s2016_s4, 20480, %s290_s15, [#allocation6], %s1802_s22, %s1802_s22, %s1803_s23  }
  0x17   : > { %s1769_s26 = scalar_lea.vmem %s309_s19, 12288  ;;  %p1777_p7 = scmp.lt.s32.totalorder %s309_s19, %s309_s19 }
  0x18   : > { %p1770_p0 = scmp.ne.s32.totalorder %s309_s19, %s1769_s26  ;;  %p1778_p8 = scmp.lt.s32.totalorder %s1769_s26, %s1769_s26 }
  0x1a   : > { %p1772_p1 = pnand %p1770_p0, %p1734_p6  ;;  %p1779_p10 = por %p1778_p8, %p1777_p7 }
  0x1c   : > { %p1773_p4 = pneg %p1772_p1 }
  0x1e   : > { %p1780_p9 = pnand %p1779_p10, %p1773_p4 }
  0x20   : > { %1783 = shalt.err (!%p1780_p9)
}
  0x21   : > { %s1804_s27 = smov 128   ;;  %s1805_s28 = smov 8  }
  0x22   : > { %1709 = dma.hbm_to_vmem [thread:$0]  (!%p1882_p5), %s2019_s7, 12288, %s309_s19, [#allocation8], %s1804_s27, %s1804_s27, %s1805_s28  }
  0x23   : > { %338 = sbr.rel (%p1873_p2) target bundleno = 723 (0x2d3), region = 60 }
  0x28   : > { %1789 = dma.done.wait (%p1710_p3), [#allocation6], 20480  }
  0x29   : > { %1791 = vsyncadd (%p1710_p3), [#allocation6], 4294946816 }
  0x2a   : > { %1793 = dma.done.wait (%p1710_p3), [#allocation8], 12288  }
  0x2b   : > { %1795 = vsyncadd (%p1710_p3), [#allocation8], 4294955008  ;;  %p378_p6 = scmp.lt.s32.totalorder %s1869_s16, 1  ;;  %vm390_vm0 = vcmask 7168   ;;  %v1806_v0 = vmov 0   ;;  %v1807_v1 = vmov 0.0  }
  0x2c   : > { %1731 = vset.pattern.permute.xlu1 %v1806_v0  ;;  %1730 = vset.pattern.permute.xlu0 %v1806_v0  ;;  %391 = vst.msk [vmem:[#allocation2] sm:$0xff] %vm390_vm0, %v1807_v1  ;;  %392 = vst.msk [vmem:[#allocation2 + $0x8] sm:$0xff] %vm390_vm0, %v1807_v1  ;;  %v653_v4 = vld [vmem:[#allocation5 + $0xf8] sm:$0xff]  ;;  %v652_v5 = vld [vmem:[#allocation5 + $0xf0] sm:$0xff]  ;;  %vm1059_vm1 = vcmask 1040384   ;;  %vm1096_vm2 = vcmask 1046528  }
  0x2d   : > { %393 = vst.msk [vmem:[#allocation2 + $0x10] sm:$0xff] %vm390_vm0, %v1807_v1  ;;  %607 = vst [vmem:[#allocation3] sm:$0xff] %v1807_v1  ;;  %s2026_s16 = smov (!%p378_p6, %s1869_s16), 1  ;;  %782 = vmatprep.subr.mxu0 %v653_v4  ;;  %v651_v6 = vld [vmem:[#allocation5 + $0xe8] sm:$0xff]  ;;  %v650_v7 = vld [vmem:[#allocation5 + $0xe0] sm:$0xff]  ;;  %vm1115_vm3 = vcmask 1045504  }
  0x2e   : > { %608 = vst [vmem:[#allocation3 + $0x8] sm:$0xff] %v1807_v1  ;;  %609 = vst [vmem:[#allocation3 + $0x10] sm:$0xf] %v1807_v1  ;;  %s1580_s11 = sshll.u32 %s2026_s16, 4  ;;  %783 = vmatpush1.msra.mxu0 %v652_v5  ;;  %v649_v8 = vld [vmem:[#allocation5 + $0xd8] sm:$0xff]  ;;  %v648_v9 = vld [vmem:[#allocation5 + $0xd0] sm:$0xff]  ;;  %s385_s29 = scalar_lea.vmem %s2022_s10, %s2026_s16 }
  0x2f   : > { %1049 = vst [vmem:[#allocation4 + $0x28] sm:$0xff] %v1807_v1  ;;  %1050 = vst [vmem:[#allocation4 + $0x10] sm:$0xff] %v1807_v1  ;;  %s382_s15 = scalar_lea.vmem %s2012_s0, %s1580_s11  ;;  %784 = vmatprep.subr.mxu0 %v651_v6  ;;  %v647_v10 = vld [vmem:[#allocation5 + $0xc8] sm:$0xff]  ;;  %v646_v11 = vld [vmem:[#allocation5 + $0xc0] sm:$0xff] }
  0x30   : > { %1053 = vst [vmem:[#allocation4 + $0x18] sm:$0x3] %v1807_v1  ;;  %1054 = vst [vmem:[#allocation4 + $0x20] sm:$0x3] %v1807_v1  ;;  %v386_v2 = vld [vmem:[%s382_s15] sm:$0xff]  ;;  %v387_v3 = vld [vmem:[%s382_s15 + $0x8] sm:$0xff]  ;;  %785 = vmatpush1.msra.mxu0 %v650_v7 }
  0x31   : > { %394 = vst.msk [vmem:[#allocation2 + $0x4] sm:$0xff] %vm390_vm0, %v386_v2  ;;  %395 = vst.msk [vmem:[#allocation2 + $0xc] sm:$0xff] %vm390_vm0, %v387_v3  ;;  %786 = vmatprep.subr.mxu0 %v649_v8  ;;  %v717_v12 = vld [vmem:[#allocation5 + $0x2f8] sm:$0xff]  ;;  %v716_v13 = vld [vmem:[#allocation5 + $0x2f0] sm:$0xff] }
  0x32   : > { %787 = vmatpush1.msra.mxu0 %v648_v9  ;;  %v645_v14 = vld [vmem:[#allocation5 + $0xb8] sm:$0xff]  ;;  %859 = vmatprep.subr.mxu1 %v717_v12  ;;  %v715_v15 = vld [vmem:[#allocation5 + $0x2e8] sm:$0xff]  ;;  %v644_v18 = vld [vmem:[#allocation5 + $0xb0] sm:$0xff] }
  0x33   : > { %788 = vmatprep.subr.mxu0 %v647_v10  ;;  %860 = vmatpush1.msra.mxu1 %v716_v13  ;;  %v643_v19 = vld [vmem:[#allocation5 + $0xa8] sm:$0xff]  ;;  %v642_v22 = vld [vmem:[#allocation5 + $0xa0] sm:$0xff]  ;;  %v641_v23 = vld [vmem:[#allocation5 + $0x98] sm:$0xff] }
  0x34   : > { %789 = vmatpush1.msra.mxu0 %v646_v11  ;;  %861 = vmatprep.subr.mxu1 %v715_v15  ;;  %v640_v25 = vld [vmem:[#allocation5 + $0x90] sm:$0xff]  ;;  %v714_v26 = vld [vmem:[#allocation5 + $0x2e0] sm:$0xff]  ;;  %v713_v28 = vld [vmem:[#allocation5 + $0x2d8] sm:$0xff] }
  0x35   : > { %790 = vmatprep.subr.mxu0 %v645_v14  ;;  %862 = vmatpush1.msra.mxu1 %v714_v26  ;;  %v712_v29 = vld [vmem:[#allocation5 + $0x2d0] sm:$0xff]  ;;  %v639_v30 = vld [vmem:[#allocation5 + $0x88] sm:$0xff]  ;;  %v638_v32 = vld [vmem:[#allocation5 + $0x80] sm:$0xff] }
  0x36   : > { %791 = vmatpush1.msra.mxu0 %v644_v18  ;;  %863 = vmatprep.subr.mxu1 %v713_v28  ;;  %v711_v31 = vld [vmem:[#allocation5 + $0x2c8] sm:$0xff]  ;;  %v710_v33 = vld [vmem:[#allocation5 + $0x2c0] sm:$0xff]  ;;  %v637_v34 = vld [vmem:[#allocation5 + $0x78] sm:$0xff] }
  0x37   : > { %792 = vmatprep.subr.mxu0 %v643_v19  ;;  %864 = vmatpush1.msra.mxu1 %v712_v29  ;;  %v709_v35 = vld [vmem:[#allocation5 + $0x2b8] sm:$0xff]  ;;  %v636_v38 = vld [vmem:[#allocation5 + $0x70] sm:$0xff]  ;;  %v635_v40 = vld [vmem:[#allocation5 + $0x68] sm:$0xff] }
  0x38   : > { %v443_v16 = vld [vmem:[#allocation2 + $0x2] sm:$0xff]  ;;  %793 = vmatpush1.msra.mxu0 %v642_v22  ;;  %865 = vmatprep.subr.mxu1 %v711_v31  ;;  %v708_v39 = vld [vmem:[#allocation5 + $0x2b0] sm:$0xff]  ;;  %v633_v46 = vld [vmem:[#allocation5 + $0x58] sm:$0xff] }
  0x39   : > { %v396_v17 = vld [vmem:[#allocation2] sm:$0xff]  ;;  %449 = vperm.xlu1 %1731, %v443_v16   ;;  %794 = vmatprep.subr.mxu0 %v641_v23  ;;  %v707_v41 = vld [vmem:[#allocation5 + $0x2a8] sm:$0xff]  ;;  %v705_v47 = vld [vmem:[#allocation5 + $0x298] sm:$0xff] }
  0x3a   : > { %401 = vperm.xlu0 %1730, %v396_v17   ;;  %v467_v20 = vld [vmem:[#allocation2 + $0x3] sm:$0xff]  ;;  %795 = vmatpush1.msra.mxu0 %v640_v25  ;;  %v632_v48 = vld [vmem:[#allocation5 + $0x50] sm:$0xff]  ;;  %v629_v56 = vld [vmem:[#allocation5 + $0x38] sm:$0xff] }
  0x3b   : > { %v419_v21 = vld [vmem:[#allocation2 + $0x1] sm:$0xff]  ;;  %796 = vmatprep.subr.mxu0 %v639_v30  ;;  %866 = vmatpush1.msra.mxu1 %v710_v33  ;;  %v420_v44 = vld [vmem:[#allocation2 + $0x9] sm:$0xff]  ;;  %v701_v57 = vld [vmem:[#allocation5 + $0x278] sm:$0xff] }
  0x3c   : > { %v515_v24 = vld [vmem:[#allocation2 + $0x5] sm:$0xff]  ;;  %797 = vmatpush1.msra.mxu0 %v638_v32  ;;  %867 = vmatprep.subr.mxu1 %v709_v35  ;;  %v704_v49 = vld [vmem:[#allocation5 + $0x290] sm:$0xff]  ;;  %v625_v3 = vld [vmem:[#allocation5 + $0x18] sm:$0xff] }
  0x3d   : > { %473 = vperm.xlu1 %1731, %v467_v20   ;;  %v491_v27 = vld [vmem:[#allocation2 + $0x4] sm:$0xff]  ;;  %798 = vmatprep.subr.mxu0 %v637_v34  ;;  %v628_v58 = vld [vmem:[#allocation5 + $0x30] sm:$0xff]  ;;  %v697_v4 = vld [vmem:[#allocation5 + $0x258] sm:$0xff] }
  0x3e   : > { %425 = vperm.xlu0 %1730, %v419_v21   ;;  %v563_v36 = vld [vmem:[#allocation2 + $0x7] sm:$0xff]  ;;  %799 = vmatpush1.msra.mxu0 %v636_v38  ;;  %v700_v59 = vld [vmem:[#allocation5 + $0x270] sm:$0xff]  ;;  %v685_v13 = vld [vmem:[#allocation5 + $0x1f8] sm:$0xff] }
  0x3f   : > { %v539_v37 = vld [vmem:[#allocation2 + $0x6] sm:$0xff]  ;;  %868 = vmatpush1.msra.mxu1 %v708_v39  ;;  %800 = vmatprep.subr.mxu0 %v635_v40  ;;  %v564_v5 = vld [vmem:[#allocation2 + $0xf] sm:$0xff]  ;;  %v693_v14 = vld [vmem:[#allocation5 + $0x238] sm:$0xff] }
  0x40   : > { %v634_v42 = vld [vmem:[#allocation5 + $0x60] sm:$0xff]  ;;  %v397_v45 = vld [vmem:[#allocation2 + $0x8] sm:$0xff]  ;;  %869 = vmatprep.subr.mxu1 %v707_v41  ;;  %v624_v7 = vld [vmem:[#allocation5 + $0x10] sm:$0xff] }
  0x41   : > { %521 = vperm.xlu1 %1731, %v515_v24   ;;  %v706_v43 = vld [vmem:[#allocation5 + $0x2a0] sm:$0xff]  ;;  %801 = vmatpush1.msra.mxu0 %v634_v42  ;;  %v631_v50 = vld [vmem:[#allocation5 + $0x48] sm:$0xff]  ;;  %v696_v8 = vld [vmem:[#allocation5 + $0x250] sm:$0xff] }
  0x42   : > { %497 = vperm.xlu0 %1730, %v491_v27   ;;  %870 = vmatpush1.msra.mxu1 %v706_v43  ;;  %v703_v51 = vld [vmem:[#allocation5 + $0x288] sm:$0xff]  ;;  %v630_v54 = vld [vmem:[#allocation5 + $0x40] sm:$0xff]  ;;  %v684_v15 = vld [vmem:[#allocation5 + $0x1f0] sm:$0xff] }
  0x43   : > { %v468_v52 = vld [vmem:[#allocation2 + $0xb] sm:$0xff]  ;;  %802 = vmatprep.subr.mxu0 %v633_v46  ;;  %871 = vmatprep.subr.mxu1 %v705_v47  ;;  %v702_v55 = vld [vmem:[#allocation5 + $0x280] sm:$0xff]  ;;  %v681_v21 = vld [vmem:[#allocation5 + $0x1d8] sm:$0xff] }
  0x44   : > { %v444_v53 = vld [vmem:[#allocation2 + $0xa] sm:$0xff]  ;;  %803 = vmatpush1.msra.mxu0 %v632_v48  ;;  %872 = vmatpush1.msra.mxu1 %v704_v49  ;;  %v626_v0 = vld [vmem:[#allocation5 + $0x20] sm:$0xff]  ;;  %v689_v22 = vld [vmem:[#allocation5 + $0x218] sm:$0xff] }
  0x45   : > { %569 = vperm.xlu1 %1731, %v563_v36   ;;  %804 = vmatprep.subr.mxu0 %v631_v50  ;;  %v516_v60 = vld [vmem:[#allocation2 + $0xd] sm:$0xff]  ;;  %v698_v2 = vld [vmem:[#allocation5 + $0x260] sm:$0xff]  ;;  %v677_v29 = vld [vmem:[#allocation5 + $0x1b8] sm:$0xff] }
  0x46   : > { %545 = vperm.xlu0 %1730, %v539_v37   ;;  %873 = vmatprep.subr.mxu1 %v703_v51  ;;  %v492_v61 = vld [vmem:[#allocation2 + $0xc] sm:$0xff]  ;;  %v622_v11 = vld [vmem:[#allocation5] sm:$0xff]  ;;  %v749_v30 = vld [vmem:[#allocation5 + $0x3f8] sm:$0xff] }
  0x47   : > { %805 = vmatpush1.msra.mxu0 %v630_v54  ;;  %874 = vmatpush1.msra.mxu1 %v702_v55  ;;  %v627_v62 = vld [vmem:[#allocation5 + $0x28] sm:$0xff]  ;;  %v694_v12 = vld [vmem:[#allocation5 + $0x240] sm:$0xff]  ;;  %v692_v16 = vld [vmem:[#allocation5 + $0x230] sm:$0xff] }
  0x48   : > { %806 = vmatprep.subr.mxu0 %v629_v56  ;;  %875 = vmatprep.subr.mxu1 %v701_v57  ;;  %v699_v63 = vld [vmem:[#allocation5 + $0x268] sm:$0xff]  ;;  %v682_v19 = vld [vmem:[#allocation5 + $0x1e0] sm:$0xff]  ;;  %v680_v23 = vld [vmem:[#allocation5 + $0x1d0] sm:$0xff] }
  0x49   : > { %430 = vperm.xlu1 %1731, %v420_v44   ;;  %807 = vmatpush1.msra.mxu0 %v628_v58  ;;  %v540_v6 = vld [vmem:[#allocation2 + $0xe] sm:$0xff]  ;;  %v690_v20 = vld [vmem:[#allocation5 + $0x220] sm:$0xff]  ;;  %v673_v37 = vld [vmem:[#allocation5 + $0x198] sm:$0xff] }
  0x4a   : > { %406 = vperm.xlu0 %1730, %v397_v45   ;;  %876 = vmatpush1.msra.mxu1 %v700_v59  ;;  %v623_v9 = vld [vmem:[#allocation5 + $0x8] sm:$0xff]  ;;  %v688_v24 = vld [vmem:[#allocation5 + $0x210] sm:$0xff]  ;;  %v678_v27 = vld [vmem:[#allocation5 + $0x1c0] sm:$0xff] }
  0x4b   : > { %808 = vmatprep.subr.mxu0 %v627_v62  ;;  %877 = vmatprep.subr.mxu1 %v699_v63  ;;  %v695_v10 = vld [vmem:[#allocation5 + $0x248] sm:$0xff]  ;;  %v686_v28 = vld [vmem:[#allocation5 + $0x200] sm:$0xff]  ;;  %v676_v31 = vld [vmem:[#allocation5 + $0x1b0] sm:$0xff] }
  0x4c   : > { %809 = vmatpush1.msra.mxu0 %v626_v0  ;;  %878 = vmatpush1.msra.mxu1 %v698_v2  ;;  %v683_v17 = vld [vmem:[#allocation5 + $0x1e8] sm:$0xff]  ;;  %v748_v32 = vld [vmem:[#allocation5 + $0x3f0] sm:$0xff]  ;;  %v674_v35 = vld [vmem:[#allocation5 + $0x1a0] sm:$0xff] }
  0x4d   : > { %478 = vperm.xlu1 %1731, %v468_v52   ;;  %810 = vmatprep.subr.mxu0 %v625_v3  ;;  %v691_v18 = vld [vmem:[#allocation5 + $0x228] sm:$0xff]  ;;  %v746_v36 = vld [vmem:[#allocation5 + $0x3e0] sm:$0xff]  ;;  %v745_v38 = vld [vmem:[#allocation5 + $0x3d8] sm:$0xff] }
  0x4e   : > { %454 = vperm.xlu0 %1730, %v444_v53   ;;  %879 = vmatprep.subr.mxu1 %v697_v4  ;;  %v679_v25 = vld [vmem:[#allocation5 + $0x1c8] sm:$0xff]  ;;  %v672_v39 = vld [vmem:[#allocation5 + $0x190] sm:$0xff]  ;;  %v670_v43 = vld [vmem:[#allocation5 + $0x180] sm:$0xff] }
  0x4f   : > { %811 = vmatpush1.msra.mxu0 %v624_v7  ;;  %880 = vmatpush1.msra.mxu1 %v696_v8  ;;  %v687_v26 = vld [vmem:[#allocation5 + $0x208] sm:$0xff]  ;;  %v744_v40 = vld [vmem:[#allocation5 + $0x3d0] sm:$0xff]  ;;  %v742_v44 = vld [vmem:[#allocation5 + $0x3c0] sm:$0xff] }
  0x50   : > { %812 = vmatprep.subr.mxu0 %v623_v9  ;;  %881 = vmatprep.subr.mxu1 %v695_v10  ;;  %v675_v33 = vld [vmem:[#allocation5 + $0x1a8] sm:$0xff]  ;;  %v669_v45 = vld [vmem:[#allocation5 + $0x178] sm:$0xff]  ;;  %v668_v47 = vld [vmem:[#allocation5 + $0x170] sm:$0xff] }
  0x51   : > { %526 = vperm.xlu1 %1731, %v516_v60   ;;  %813 = vmatpush1.msra.mxu0 %v622_v11  ;;  %v747_v34 = vld [vmem:[#allocation5 + $0x3e8] sm:$0xff]  ;;  %v741_v46 = vld [vmem:[#allocation5 + $0x3b8] sm:$0xff]  ;;  %v740_v48 = vld [vmem:[#allocation5 + $0x3b0] sm:$0xff] }
  0x52   : > { %502 = vperm.xlu0 %1730, %v492_v61   ;;  %882 = vmatpush1.msra.mxu1 %v694_v12  ;;  %v671_v41 = vld [vmem:[#allocation5 + $0x188] sm:$0xff]  ;;  %v666_v51 = vld [vmem:[#allocation5 + $0x160] sm:$0xff]  ;;  %v665_v53 = vld [vmem:[#allocation5 + $0x158] sm:$0xff] }
  0x53   : > { %814 = vmatprep.subr.mxu0 %v685_v13  ;;  %883 = vmatprep.subr.mxu1 %v693_v14  ;;  %v743_v42 = vld [vmem:[#allocation5 + $0x3c8] sm:$0xff]  ;;  %v738_v52 = vld [vmem:[#allocation5 + $0x3a0] sm:$0xff]  ;;  %v737_v54 = vld [vmem:[#allocation5 + $0x398] sm:$0xff] }
  0x54   : > { %815 = vmatpush2.msra.mxu0 %v684_v15  ;;  %884 = vmatpush1.msra.mxu1 %v692_v16  ;;  %v667_v49 = vld [vmem:[#allocation5 + $0x168] sm:$0xff]  ;;  %v664_v55 = vld [vmem:[#allocation5 + $0x150] sm:$0xff]  ;;  %v662_v59 = vld [vmem:[#allocation5 + $0x140] sm:$0xff] }
  0x55   : > { %574 = vperm.xlu1 %1731, %v564_v5   ;;  %816 = vmatprep.subr.mxu0 %v683_v17  ;;  %v739_v50 = vld [vmem:[#allocation5 + $0x3a8] sm:$0xff]  ;;  %v736_v56 = vld [vmem:[#allocation5 + $0x390] sm:$0xff]  ;;  %v734_v60 = vld [vmem:[#allocation5 + $0x380] sm:$0xff] }
  0x56   : > { %550 = vperm.xlu0 %1730, %v540_v6   ;;  %885 = vmatprep.subr.mxu1 %v691_v18  ;;  %v663_v57 = vld [vmem:[#allocation5 + $0x148] sm:$0xff]  ;;  %v661_v61 = vld [vmem:[#allocation5 + $0x138] sm:$0xff]  ;;  %v660_v63 = vld [vmem:[#allocation5 + $0x130] sm:$0xff] }
  0x57   : > { %817 = vmatpush2.msra.mxu0 %v682_v19  ;;  %886 = vmatpush1.msra.mxu1 %v690_v20  ;;  %v735_v58 = vld [vmem:[#allocation5 + $0x388] sm:$0xff]  ;;  %v733_v62 = vld [vmem:[#allocation5 + $0x378] sm:$0xff]  ;;  %v732_v0 = vld [vmem:[#allocation5 + $0x370] sm:$0xff] }
  0x58   : > { %818 = vmatprep.subr.mxu0 %v681_v21  ;;  %887 = vmatprep.subr.mxu1 %v689_v22  ;;  %v659_v2 = vld [vmem:[#allocation5 + $0x128] sm:$0xff]  ;;  %v658_v4 = vld [vmem:[#allocation5 + $0x120] sm:$0xff]  ;;  %v657_v6 = vld [vmem:[#allocation5 + $0x118] sm:$0xff] }
  0x59   : > { %819 = vmatpush2.msra.mxu0 %v680_v23  ;;  %888 = vmatpush1.msra.mxu1 %v688_v24  ;;  %v731_v3 = vld [vmem:[#allocation5 + $0x368] sm:$0xff]  ;;  %v730_v5 = vld [vmem:[#allocation5 + $0x360] sm:$0xff]  ;;  %v729_v7 = vld [vmem:[#allocation5 + $0x358] sm:$0xff] }
  0x5a   : > { %820 = vmatprep.subr.mxu0 %v679_v25  ;;  %889 = vmatprep.subr.mxu1 %v687_v26  ;;  %v656_v8 = vld [vmem:[#allocation5 + $0x110] sm:$0xff]  ;;  %v655_v10 = vld [vmem:[#allocation5 + $0x108] sm:$0xff]  ;;  %v654_v12 = vld [vmem:[#allocation5 + $0x100] sm:$0xff] }
  0x5b   : > { %821 = vmatpush2.msra.mxu0 %v678_v27  ;;  %890 = vmatpush1.msra.mxu1 %v686_v28  ;;  %v728_v9 = vld [vmem:[#allocation5 + $0x350] sm:$0xff]  ;;  %v727_v11 = vld [vmem:[#allocation5 + $0x348] sm:$0xff]  ;;  %v726_v13 = vld [vmem:[#allocation5 + $0x340] sm:$0xff] }
  0x5c   : > { %822 = vmatprep.subr.mxu0 %v677_v29  ;;  %891 = vmatprep.subr.mxu1 %v749_v30  ;;  %v781_v14 = vld [vmem:[#allocation5 + $0x4f8] sm:$0xff]  ;;  %v724_v16 = vld [vmem:[#allocation5 + $0x330] sm:$0xff]  ;;  %v723_v17 = vld [vmem:[#allocation5 + $0x328] sm:$0xff] }
  0x5d   : > { %823 = vmatpush2.msra.mxu0 %v676_v31  ;;  %892 = vmatpush2.msra.mxu1 %v748_v32  ;;  %v725_v15 = vld [vmem:[#allocation5 + $0x338] sm:$0xff]  ;;  %v722_v18 = vld [vmem:[#allocation5 + $0x320] sm:$0xff]  ;;  %v720_v20 = vld [vmem:[#allocation5 + $0x310] sm:$0xff] }
  0x5e   : > { %824 = vmatprep.subr.mxu0 %v675_v33  ;;  %893 = vmatprep.subr.mxu1 %v747_v34  ;;  %v721_v19 = vld [vmem:[#allocation5 + $0x318] sm:$0xff]  ;;  %v719_v21 = vld [vmem:[#allocation5 + $0x308] sm:$0xff]  ;;  %v718_v22 = vld [vmem:[#allocation5 + $0x300] sm:$0xff] }
  0x5f   : > { %825 = vmatpush2.msra.mxu0 %v674_v35  ;;  %894 = vmatpush2.msra.mxu1 %v746_v36  ;;  %v1559_v25 = vld [vmem:[%s2013_s1] ss:$0 sm:$0xff]  ;;  %v1561_v26 = vld [vmem:[%s2013_s1 + $0x1] ss:$0 sm:$0xff]  ;;  %v1563_v27 = vld [vmem:[%s2013_s1 + $0x2] ss:$0 sm:$0xff] }
  0x60   : > { %826 = vmatprep.subr.mxu0 %v673_v37  ;;  %895 = vmatprep.subr.mxu1 %v745_v38  ;;  %v1565_v32 = vld [vmem:[%s2013_s1 + $0x3] ss:$0 sm:$0xff]  ;;  %v1567_v36 = vld [vmem:[%s2013_s1 + $0x4] ss:$0 sm:$0xff] }
  0x61   : > { %827 = vmatpush2.msra.mxu0 %v672_v39  ;;  %896 = vmatpush2.msra.mxu1 %v744_v40  ;;  %v1569_v40 = vld [vmem:[%s2013_s1 + $0x5] ss:$0 sm:$0xff] }
  0x62   : > { %828 = vmatprep.subr.mxu0 %v671_v41  ;;  %897 = vmatprep.subr.mxu1 %v743_v42 }
  0x63   : > { %829 = vmatpush2.msra.mxu0 %v670_v43  ;;  %898 = vmatpush2.msra.mxu1 %v742_v44  ;;  %v1571_v44 = vld [vmem:[%s2013_s1 + $0x6] ss:$0 sm:$0xff] }
  0x64   : > { %830 = vmatprep.subr.mxu0 %v669_v45  ;;  %899 = vmatprep.subr.mxu1 %v741_v46 }
  0x65   : > { %831 = vmatpush2.msra.mxu0 %v668_v47  ;;  %900 = vmatpush2.msra.mxu1 %v740_v48  ;;  %v1573_v48 = vld [vmem:[%s2013_s1 + $0x7] ss:$0 sm:$0xff] }
  0x66   : > { %832 = vmatprep.subr.mxu0 %v667_v49  ;;  %901 = vmatprep.subr.mxu1 %v739_v50 }
  0x67   : > { %833 = vmatpush2.msra.mxu0 %v666_v51  ;;  %902 = vmatpush2.msra.mxu1 %v738_v52 }
  0x68   : > { %834 = vmatprep.subr.mxu0 %v665_v53  ;;  %903 = vmatprep.subr.mxu1 %v737_v54 }
  0x69   : > { %835 = vmatpush2.msra.mxu0 %v664_v55  ;;  %904 = vmatpush2.msra.mxu1 %v736_v56 }
  0x6a   : > { %836 = vmatprep.subr.mxu0 %v663_v57  ;;  %905 = vmatprep.subr.mxu1 %v735_v58  ;;  %v1574_v57 = vld [vmem:[%s2014_s2] ss:$0 sm:$0xff] }
  0x6b   : > { %837 = vmatpush2.msra.mxu0 %v662_v59  ;;  %906 = vmatpush2.msra.mxu1 %v734_v60  ;;  %v1575_v59 = vld [vmem:[%s2015_s3] ss:$0 sm:$0xff] }
  0x6c   : > { %838 = vmatprep.subr.mxu0 %v661_v61  ;;  %907 = vmatprep.subr.mxu1 %v733_v62 }
  0x6d   : > { %839 = vmatpush2.msra.mxu0 %v660_v63  ;;  %908 = vmatpush2.msra.mxu1 %v732_v0 }
  0x6e   : > { %840 = vmatprep.subr.mxu0 %v659_v2  ;;  %909 = vmatprep.subr.mxu1 %v731_v3 }
  0x6f   : > { %841 = vmatpush2.msra.mxu0 %v658_v4  ;;  %910 = vmatpush2.msra.mxu1 %v730_v5 }
  0x70   : > { %842 = vmatprep.subr.mxu0 %v657_v6  ;;  %911 = vmatprep.subr.mxu1 %v729_v7 }
  0x71   : > { %843 = vmatpush2.msra.mxu0 %v656_v8  ;;  %912 = vmatpush2.msra.mxu1 %v728_v9 }
  0x72   : > { %844 = vmatprep.subr.mxu0 %v655_v10  ;;  %913 = vmatprep.subr.mxu1 %v727_v11 }
  0x73   : > { %845 = vmatpush2.msra.mxu0 %v654_v12  ;;  %914 = vmatpush2.msra.mxu1 %v726_v13 }
  0x74   : > { %936 = vmatprep.subr.mxu0 %v781_v14  ;;  %915 = vmatprep.subr.mxu1 %v725_v15 }
  0x75   : > { %916 = vmatpush2.msra.mxu1 %v724_v16 }
  0x76   : > { %917 = vmatprep.subr.mxu1 %v723_v17 }
  0x77   : > { %918 = vmatpush2.msra.mxu1 %v722_v18 }
  0x78   : > { %919 = vmatprep.subr.mxu1 %v721_v19 }
  0x79   : > { %920 = vmatpush2.msra.mxu1 %v720_v20 }
  0x7a   : > { %921 = vmatprep.subr.mxu1 %v719_v21  ;;  %v780_v21 = vld [vmem:[#allocation5 + $0x4f0] sm:$0xff] }
  0x7b   : > { %922 = vmatpush2.msra.mxu1 %v718_v22 }
  0xb4   : > { %v450_v23 = vpop.permute.xlu1 %449 }
  0xb5   : > { %v402_v24 = vpop.permute.xlu0 %401  ;;  %v463_v33 = vmul.f32 %v1563_v27, %v450_v23  ;;  %v779_v23 = vld [vmem:[#allocation5 + $0x4e8] sm:$0xff] }
  0xb6   : > { %v415_v30 = vmul.f32 %v1559_v25, %v402_v24  ;;  %v778_v24 = vld [vmem:[#allocation5 + $0x4e0] sm:$0xff] }
  0xb8   : > { %v474_v28 = vpop.permute.xlu1 %473 }
  0xb9   : > { %v426_v29 = vpop.permute.xlu0 %425  ;;  %v487_v38 = vmul.f32 %v1565_v32, %v474_v28 }
  0xba   : > { %v439_v31 = vmul.f32 %v1561_v26, %v426_v29  ;;  %v775_v29 = vld [vmem:[#allocation5 + $0x4c8] sm:$0xff] }
  0xbc   : > { %v441_v34 = vadd.f32 %v439_v31, %v415_v30  ;;  %v522_v35 = vpop.permute.xlu1 %521  ;;  %v774_v30 = vld [vmem:[#allocation5 + $0x4c0] sm:$0xff]  ;;  %v773_v31 = vld [vmem:[#allocation5 + $0x4b8] sm:$0xff] }
  0xbd   : > { %v498_v37 = vpop.permute.xlu0 %497  ;;  %v535_v46 = vmul.f32 %v1569_v40, %v522_v35  ;;  %v769_v35 = vld [vmem:[#allocation5 + $0x498] sm:$0xff] }
  0xbe   : > { %v465_v39 = vadd.f32 %v463_v33, %v441_v34  ;;  %v511_v42 = vmul.f32 %v1567_v36, %v498_v37  ;;  %v771_v33 = vld [vmem:[#allocation5 + $0x4a8] sm:$0xff]  ;;  %v770_v34 = vld [vmem:[#allocation5 + $0x4a0] sm:$0xff] }
  0xbf   : > { %v767_v37 = vld [vmem:[#allocation5 + $0x488] sm:$0xff] }
  0xc0   : > { %v489_v41 = vadd.f32 %v487_v38, %v465_v39  ;;  %v570_v43 = vpop.permute.xlu1 %569 }
  0xc1   : > { %v546_v45 = vpop.permute.xlu0 %545  ;;  %v583_v53 = vmul.f32 %v1573_v48, %v570_v43 }
  0xc2   : > { %v513_v47 = vadd.f32 %v511_v42, %v489_v41  ;;  %v559_v50 = vmul.f32 %v1571_v44, %v546_v45  ;;  %v766_v41 = vld [vmem:[#allocation5 + $0x480] sm:$0xff]  ;;  %v765_v42 = vld [vmem:[#allocation5 + $0x478] sm:$0xff]  ;;  %v763_v45 = vld [vmem:[#allocation5 + $0x468] sm:$0xff] }
  0xc4   : > { %v537_v49 = vadd.f32 %v535_v46, %v513_v47  ;;  %v431_v51 = vpop.permute.xlu1 %430  ;;  %v762_v46 = vld [vmem:[#allocation5 + $0x460] sm:$0xff]  ;;  %v761_v47 = vld [vmem:[#allocation5 + $0x458] sm:$0xff] }
  0xc5   : > { %v407_v52 = vpop.permute.xlu0 %406  ;;  %v440_v55 = vmul.f32 %v1561_v26, %v431_v51  ;;  %v777_v26 = vld [vmem:[#allocation5 + $0x4d8] sm:$0xff] }
  0xc6   : > { %v561_v54 = vadd.f32 %v559_v50, %v537_v49  ;;  %v416_v56 = vmul.f32 %v1559_v25, %v407_v52  ;;  %v759_v49 = vld [vmem:[#allocation5 + $0x448] sm:$0xff]  ;;  %v758_v50 = vld [vmem:[#allocation5 + $0x440] sm:$0xff]  ;;  %v757_v51 = vld [vmem:[#allocation5 + $0x438] sm:$0xff] }
  0xc7   : > { %v756_v52 = vld [vmem:[#allocation5 + $0x430] sm:$0xff] }
  0xc8   : > { %v585_v58 = vadd.f32 %v583_v53, %v561_v54  ;;  %v479_v60 = vpop.permute.xlu1 %478  ;;  %v442_v63 = vadd.f32 %v440_v55, %v416_v56  ;;  %v755_v53 = vld [vmem:[#allocation5 + $0x428] sm:$0xff]  ;;  %v754_v54 = vld [vmem:[#allocation5 + $0x420] sm:$0xff]  ;;  %v753_v55 = vld [vmem:[#allocation5 + $0x418] sm:$0xff] }
  0xc9   : > { %v455_v61 = vpop.permute.xlu0 %454  ;;  %v488_v3 = vmul.f32 %v1565_v32, %v479_v60  ;;  %v772_v32 = vld [vmem:[#allocation5 + $0x4b0] sm:$0xff] }
  0xca   : > { %v593_v62 = vmul.f32 %v1574_v57, %v585_v58  ;;  %v464_v0 = vmul.f32 %v1563_v27, %v455_v61  ;;  %v776_v27 = vld [vmem:[#allocation5 + $0x4d0] sm:$0xff]  ;;  %v750_v58 = vld [vmem:[#allocation5 + $0x400] sm:$0xff]  ;;  %v1161_v61 = vld [vmem:[#allocation7 + $0xf8] sm:$0xff] }
  0xcb   : > { %v752_v56 = vld [vmem:[#allocation5 + $0x410] sm:$0xff]  ;;  %1581 = vmatprep.subr.mxu1 %v1161_v61  ;;  %v1162_v61 = vld [vmem:[#allocation7 + $0x100] sm:$0xff] }
  0xcc   : > { %v601_v2 = vadd.f32 %v1575_v59, %v593_v62  ;;  %v466_v4 = vadd.f32 %v464_v0, %v442_v63  ;;  %v527_v5 = vpop.permute.xlu1 %526  ;;  %v1145_v62 = vld [vmem:[#allocation7 + $0x78] sm:$0xff]  ;;  %v1160_v63 = vld [vmem:[#allocation7 + $0xf0] sm:$0xff] }
  0xcd   : > { %v503_v6 = vpop.permute.xlu0 %502  ;;  %v536_v10 = vmul.f32 %v1569_v40, %v527_v5  ;;  %v1144_v0 = vld [vmem:[#allocation7 + $0x70] sm:$0xff]  ;;  %v1193_v5 = vld [vmem:[#allocation7 + $0x1f8] sm:$0xff] }
  0xce   : > { %v603_v7 = vmax.f32 %v601_v2, 0.0  ;;  %v490_v8 = vadd.f32 %v488_v3, %v466_v4  ;;  %v512_v9 = vmul.f32 %v1567_v36, %v503_v6  ;;  %v768_v36 = vld [vmem:[#allocation5 + $0x490] sm:$0xff]  ;;  %v1159_v2 = vld [vmem:[#allocation7 + $0xe8] sm:$0xff]  ;;  %v1158_v4 = vld [vmem:[#allocation7 + $0xe0] sm:$0xff] }
  0xcf   : > { %v1143_v3 = vld [vmem:[#allocation7 + $0x68] sm:$0xff]  ;;  %v1177_v6 = vld [vmem:[#allocation7 + $0x178] sm:$0xff] }
  0xd0   : > { %610 = vst [vmem:[#allocation3 + $0x2] sm:$0xff] %v603_v7  ;;  %v514_v11 = vadd.f32 %v512_v9, %v490_v8  ;;  %v575_v12 = vpop.permute.xlu1 %574  ;;  %v1192_v8 = vld [vmem:[#allocation7 + $0x1f0] sm:$0xff]  ;;  %v1141_v9 = vld [vmem:[#allocation7 + $0x58] sm:$0xff] }
  0xd1   : > { %v551_v13 = vpop.permute.xlu0 %550  ;;  %v584_v16 = vmul.f32 %v1573_v48, %v575_v12  ;;  %v760_v48 = vld [vmem:[#allocation5 + $0x450] sm:$0xff]  ;;  %v1191_v12 = vld [vmem:[#allocation7 + $0x1e8] sm:$0xff] }
  0xd2   : > { %v538_v14 = vadd.f32 %v536_v10, %v514_v11  ;;  %v560_v15 = vmul.f32 %v1571_v44, %v551_v13  ;;  %v764_v44 = vld [vmem:[#allocation5 + $0x470] sm:$0xff]  ;;  %v1175_v13 = vld [vmem:[#allocation7 + $0x168] sm:$0xff] }
  0xd3   : > { %v1176_v10 = vld [vmem:[#allocation7 + $0x170] sm:$0xff] }
  0xd4   : > { %v562_v17 = vadd.f32 %v560_v15, %v538_v14  ;;  %v1156_v11 = vld [vmem:[#allocation7 + $0xd0] sm:$0xff]  ;;  %v1190_v14 = vld [vmem:[#allocation7 + $0x1e0] sm:$0xff] }
  0xd5   : > { %v1140_v15 = vld [vmem:[#allocation7 + $0x50] sm:$0xff] }
  0xd6   : > { %v586_v18 = vadd.f32 %v584_v16, %v562_v17  ;;  %v1174_v16 = vld [vmem:[#allocation7 + $0x160] sm:$0xff]  ;;  %v1155_v17 = vld [vmem:[#allocation7 + $0xc8] sm:$0xff] }
  0xd7   : > { %v614_v19 = vld [vmem:[#allocation3 + $0x1] sm:$0xff] }
  0xd8   : > { %v612_v20 = vld [vmem:[#allocation3] sm:$0xff]  ;;  %v594_v22 = vmul.f32 %v1574_v57, %v586_v18  ;;  %846 = vmatprep.mubr.f32.mxu0 %v614_v19  ;;  %v751_v57 = vld [vmem:[#allocation5 + $0x408] sm:$0xff] }
  0xd9   : > { %847 = vmatmul.mubr.f32.vlgmr.msra.gmra.mxu0 %v612_v20  ;;  %v1189_v18 = vld [vmem:[#allocation7 + $0x1d8] sm:$0xff]  ;;  %v1139_v19 = vld [vmem:[#allocation7 + $0x48] sm:$0xff] }
  0xda   : > { %v602_v25 = vadd.f32 %v1575_v59, %v594_v22  ;;  %937 = vmatpush1.msra.mxu0 %v780_v21  ;;  %v1173_v20 = vld [vmem:[#allocation7 + $0x158] sm:$0xff]  ;;  %v1154_v21 = vld [vmem:[#allocation7 + $0xc0] sm:$0xff]  ;;  %v1188_v22 = vld [vmem:[#allocation7 + $0x1d0] sm:$0xff] }
  0xdb   : > { %938 = vmatprep.subr.mxu0 %v779_v23  ;;  %v1138_v23 = vld [vmem:[#allocation7 + $0x40] sm:$0xff] }
  0xdc   : > { %v604_v28 = vmax.f32 %v602_v25, 0.0  ;;  %939 = vmatpush1.msra.mxu0 %v778_v24  ;;  %v1172_v24 = vld [vmem:[#allocation7 + $0x150] sm:$0xff]  ;;  %v1153_v25 = vld [vmem:[#allocation7 + $0xb8] sm:$0xff] }
  0xdd   : > { %940 = vmatprep.subr.mxu0 %v777_v26  ;;  %v1187_v26 = vld [vmem:[#allocation7 + $0x1c8] sm:$0xff] }
  0xde   : > { %611 = vst [vmem:[#allocation3 + $0xa] sm:$0xff] %v604_v28  ;;  %941 = vmatpush1.msra.mxu0 %v776_v27  ;;  %v1137_v27 = vld [vmem:[#allocation7 + $0x38] sm:$0xff] }
  0xdf   : > { %942 = vmatprep.subr.mxu0 %v775_v29  ;;  %v1152_v29 = vld [vmem:[#allocation7 + $0xb0] sm:$0xff] }
  0xe0   : > { %943 = vmatpush1.msra.mxu0 %v774_v30  ;;  %v1186_v30 = vld [vmem:[#allocation7 + $0x1c0] sm:$0xff] }
  0xe1   : > { %944 = vmatprep.subr.mxu0 %v773_v31  ;;  %v1136_v31 = vld [vmem:[#allocation7 + $0x30] sm:$0xff] }
  0xe2   : > { %945 = vmatpush1.msra.mxu0 %v772_v32  ;;  %v1170_v32 = vld [vmem:[#allocation7 + $0x140] sm:$0xff] }
  0xe3   : > { %946 = vmatprep.subr.mxu0 %v771_v33  ;;  %v1151_v33 = vld [vmem:[#allocation7 + $0xa8] sm:$0xff] }
  0xe4   : > { %947 = vmatpush1.msra.mxu0 %v770_v34  ;;  %v1185_v34 = vld [vmem:[#allocation7 + $0x1b8] sm:$0xff] }
  0xe5   : > { %948 = vmatprep.subr.mxu0 %v769_v35  ;;  %v615_v38 = vld [vmem:[#allocation3 + $0x9] sm:$0xff] }
  0xe6   : > { %v618_v39 = vld [vmem:[#allocation3 + $0x3] sm:$0xff]  ;;  %949 = vmatpush1.msra.mxu0 %v768_v36  ;;  %852 = vmatprep.mubr.f32.mxu0 %v615_v38  ;;  %v619_v43 = vld [vmem:[#allocation3 + $0xb] sm:$0xff]  ;;  %v1184_v38 = vld [vmem:[#allocation7 + $0x1b0] sm:$0xff] }
  0xe7   : > { %v613_v40 = vld [vmem:[#allocation3 + $0x8] sm:$0xff]  ;;  %923 = vmatprep.mubr.f32.mxu1 %v618_v39  ;;  %950 = vmatprep.subr.mxu0 %v767_v37  ;;  %v1135_v35 = vld [vmem:[#allocation7 + $0x28] sm:$0xff]  ;;  %v1169_v36 = vld [vmem:[#allocation7 + $0x138] sm:$0xff] }
  0xe8   : > { %853 = vmatmul.mubr.f32.gmra.mxu0 %v613_v40  ;;  %924 = vmatmul.mubr.f32.vlgmr.msra.gmra.mxu1 %v603_v7  ;;  %v620_v59 = vld [vmem:[#allocation3 + $0x4] sm:$0xff]  ;;  %v621_v60 = vld [vmem:[#allocation3 + $0xc] sm:$0xff]  ;;  %v1168_v40 = vld [vmem:[#allocation7 + $0x130] sm:$0xff] }
  0xe9   : > { %951 = vmatpush1.msra.mxu0 %v766_v41  ;;  %929 = vmatprep.mubr.f32.mxu1 %v619_v43  ;;  %v1142_v7 = vld [vmem:[#allocation7 + $0x60] sm:$0xff]  ;;  %v1149_v41 = vld [vmem:[#allocation7 + $0x98] sm:$0xff] }
  0xea   : > { %952 = vmatprep.subr.mxu0 %v765_v42  ;;  %1000 = vmatprep.mubr.f32.mxu0 %v1807_v1  ;;  %v1150_v37 = vld [vmem:[#allocation7 + $0xa0] sm:$0xff]  ;;  %v1183_v42 = vld [vmem:[#allocation7 + $0x1a8] sm:$0xff]  ;;  %v1133_v43 = vld [vmem:[#allocation7 + $0x18] sm:$0xff] }
  0xeb   : > { %953 = vmatpush1.msra.mxu0 %v764_v44  ;;  %1582 = vmatpush3.msra.mxu1 %v1145_v62  ;;  %v1134_v39 = vld [vmem:[#allocation7 + $0x20] sm:$0xff]  ;;  %v1167_v44 = vld [vmem:[#allocation7 + $0x128] sm:$0xff]  ;;  %v1014_v62 = vlaneseq }
  0xec   : > { %954 = vmatprep.subr.mxu0 %v763_v45  ;;  %930 = vmatmul.mubr.f32.gmra.mxu1 %v604_v28  ;;  %v1171_v28 = vld [vmem:[#allocation7 + $0x148] sm:$0xff]  ;;  %v1148_v45 = vld [vmem:[#allocation7 + $0x90] sm:$0xff] }
  0xed   : > { %955 = vmatpush1.msra.mxu0 %v762_v46  ;;  %1583 = vmatprep.subr.mxu1 %v1160_v63  ;;  %v1182_v46 = vld [vmem:[#allocation7 + $0x1a0] sm:$0xff] }
  0xee   : > { %956 = vmatprep.subr.mxu0 %v761_v47  ;;  %1584 = vmatpush3.msra.mxu1 %v1144_v0  ;;  %v1132_v47 = vld [vmem:[#allocation7 + $0x10] sm:$0xff] }
  0xef   : > { %957 = vmatpush1.msra.mxu0 %v760_v48  ;;  %1585 = vmatprep.subr.mxu1 %v1159_v2  ;;  %v1166_v48 = vld [vmem:[#allocation7 + $0x120] sm:$0xff]  ;;  %v1015_v2 = vshrl.u32 %v1014_v62, 7 }
  0xf0   : > { %958 = vmatprep.subr.mxu0 %v759_v49  ;;  %1586 = vmatpush3.msra.mxu1 %v1143_v3  ;;  %v1147_v49 = vld [vmem:[#allocation7 + $0x88] sm:$0xff] }
  0xf1   : > { %959 = vmatpush1.msra.mxu0 %v758_v50  ;;  %1587 = vmatprep.subr.mxu1 %v1158_v4  ;;  %v1181_v50 = vld [vmem:[#allocation7 + $0x198] sm:$0xff] }
  0xf2   : > { %960 = vmatprep.subr.mxu0 %v757_v51  ;;  %1588 = vmatpush3.msra.mxu1 %v1142_v7  ;;  %v1131_v51 = vld [vmem:[#allocation7 + $0x8] sm:$0xff]  ;;  %v605_v7 = vld [vmem:[%s2017_s5] sm:$0x3] }
  0xf3   : > { %961 = vmatpush1.msra.mxu0 %v756_v52  ;;  %v1146_v52 = vld [vmem:[#allocation7 + $0x80] sm:$0xff] }
  0xf4   : > { %962 = vmatprep.subr.mxu0 %v755_v53  ;;  %v1130_v53 = vld [vmem:[#allocation7] sm:$0xff] }
  0xf5   : > { %963 = vmatpush1.msra.mxu0 %v754_v54  ;;  %v1165_v54 = vld [vmem:[#allocation7 + $0x118] sm:$0xff] }
  0xf6   : > { %964 = vmatprep.subr.mxu0 %v753_v55  ;;  %v1180_v55 = vld [vmem:[#allocation7 + $0x190] sm:$0xff] }
  0xf7   : > { %965 = vmatpush1.msra.mxu0 %v752_v56  ;;  %v1225_v56 = vld [vmem:[#allocation7 + $0x2f8] sm:$0xff] }
  0xf8   : > { %966 = vmatprep.subr.mxu0 %v751_v57  ;;  %v1164_v57 = vld [vmem:[#allocation7 + $0x110] sm:$0xff] }
  0xf9   : > { %967 = vmatpush1.msra.mxu0 %v750_v58  ;;  %v1179_v58 = vld [vmem:[#allocation7 + $0x188] sm:$0xff] }
  0xfa   : > { %1001 = vmatmul.mubr.f32.vlgmr.msra.gmra.mxu0 %v620_v59  ;;  %1619 = vmatprep.subr.mxu0 %v1193_v5  ;;  %v1163_v59 = vld [vmem:[#allocation7 + $0x108] sm:$0xff] }
  0xfb   : > { %1006 = vmatprep.mubr.f32.mxu0 %v1807_v1  ;;  %v1157_v1 = vld [vmem:[#allocation7 + $0xd8] sm:$0xff]  ;;  %1620 = vmatpush3.msra.mxu0 %v1177_v6  ;;  %v1016_v6 = vsub.s32 0, %v1015_v2 }
  0xfc   : > { %1621 = vmatprep.subr.mxu0 %v1192_v8  ;;  %1589 = vmatprep.subr.mxu1 %v1157_v1  ;;  %v1020_v1 = vsub.s32 1, %v1015_v2 }
  0xfd   : > { %1622 = vmatpush3.msra.mxu0 %v1176_v10  ;;  %1590 = vmatpush3.msra.mxu1 %v1141_v9  ;;  %v606_v10 = vld [vmem:[%s2018_s6] sm:$0x3] }
  0xfe   : > { %1007 = vmatmul.mubr.f32.gmra.mxu0 %v621_v60  ;;  %1623 = vmatprep.subr.mxu0 %v1191_v12  ;;  %v1178_v60 = vld [vmem:[#allocation7 + $0x180] sm:$0xff]  ;;  %v1017_v12 = vrot.slane %v605_v7, %v1016_v6 }
  0xff   : > { %1624 = vmatpush3.msra.mxu0 %v1175_v13  ;;  %1591 = vmatprep.subr.mxu1 %v1156_v11 }
 0x100   : > { %1625 = vmatprep.subr.mxu0 %v1190_v14  ;;  %1592 = vmatpush3.msra.mxu1 %v1140_v15 }
 0x101   : > { %1626 = vmatpush3.msra.mxu0 %v1174_v16  ;;  %1593 = vmatprep.subr.mxu1 %v1155_v17  ;;  %v1032_v16 = vrot.slane %v606_v10, %v1016_v6  ;;  %v1021_v17 = vrot.slane %v605_v7, %v1020_v1  ;;  %v1206_v6 = vld [vmem:[#allocation7 + $0x260] sm:$0xff] }
 0x102   : > { %1627 = vmatprep.subr.mxu0 %v1189_v18  ;;  %1594 = vmatpush3.msra.mxu1 %v1139_v19 }
 0x103   : > { %1628 = vmatpush3.msra.mxu0 %v1173_v20  ;;  %1595 = vmatprep.subr.mxu1 %v1154_v21 }
 0x104   : > { %1629 = vmatprep.subr.mxu0 %v1188_v22  ;;  %1596 = vmatpush3.msra.mxu1 %v1138_v23  ;;  %v1036_v23 = vrot.slane %v606_v10, %v1020_v1  ;;  %v1221_v1 = vld [vmem:[#allocation7 + $0x2d8] sm:$0xff] }
 0x105   : > { %1630 = vmatpush3.msra.mxu0 %v1172_v24  ;;  %1597 = vmatprep.subr.mxu1 %v1153_v25 }
 0x106   : > { %1631 = vmatprep.subr.mxu0 %v1187_v26  ;;  %1598 = vmatpush3.msra.mxu1 %v1137_v27 }
 0x107   : > { %1632 = vmatpush3.msra.mxu0 %v1171_v28  ;;  %1599 = vmatprep.subr.mxu1 %v1152_v29 }
 0x108   : > { %1633 = vmatprep.subr.mxu0 %v1186_v30  ;;  %1600 = vmatpush3.msra.mxu1 %v1136_v31 }
 0x109   : > { %1634 = vmatpush3.msra.mxu0 %v1170_v32  ;;  %1601 = vmatprep.subr.mxu1 %v1151_v33 }
 0x10a   : > { %1635 = vmatprep.subr.mxu0 %v1185_v34  ;;  %1602 = vmatpush3.msra.mxu1 %v1135_v35 }
 0x10b   : > { %1636 = vmatpush3.msra.mxu0 %v1169_v36  ;;  %1603 = vmatprep.subr.mxu1 %v1150_v37 }
 0x10c   : > { %1637 = vmatprep.subr.mxu0 %v1184_v38  ;;  %1604 = vmatpush3.msra.mxu1 %v1134_v39 }
 0x10d   : > { %1638 = vmatpush3.msra.mxu0 %v1168_v40  ;;  %1605 = vmatprep.subr.mxu1 %v1149_v41 }
 0x10e   : > { %1639 = vmatprep.subr.mxu0 %v1183_v42  ;;  %1606 = vmatpush3.msra.mxu1 %v1133_v43 }
 0x10f   : > { %1640 = vmatpush3.msra.mxu0 %v1167_v44  ;;  %1607 = vmatprep.subr.mxu1 %v1148_v45 }
 0x110   : > { %1641 = vmatprep.subr.mxu0 %v1182_v46  ;;  %1608 = vmatpush3.msra.mxu1 %v1132_v47  ;;  %v1209_v47 = vld [vmem:[#allocation7 + $0x278] sm:$0xff] }
 0x111   : > { %1642 = vmatpush3.msra.mxu0 %v1166_v48  ;;  %1609 = vmatprep.subr.mxu1 %v1147_v49 }
 0x112   : > { %1643 = vmatprep.subr.mxu0 %v1181_v50  ;;  %1610 = vmatpush3.msra.mxu1 %v1131_v51 }
 0x113   : > { %1611 = vmatprep.subr.mxu1 %v1146_v52  ;;  %1644 = vmatpush3.msra.mxu0 %v1165_v54 }
 0x114   : > { %1612 = vmatpush3.msra.mxu1 %v1130_v53  ;;  %1645 = vmatprep.subr.mxu0 %v1180_v55  ;;  %v1224_v53 = vld [vmem:[#allocation7 + $0x2f0] sm:$0xff] }
 0x115   : > { %1657 = vmatprep.subr.mxu1 %v1225_v56  ;;  %1646 = vmatpush3.msra.mxu0 %v1164_v57  ;;  %v1208_v56 = vld [vmem:[#allocation7 + $0x270] sm:$0xff] }
 0x116   : > { %1647 = vmatprep.subr.mxu0 %v1179_v58 }
 0x117   : > { %1648 = vmatpush3.msra.mxu0 %v1163_v59 }
 0x118   : > { %1649 = vmatprep.subr.mxu0 %v1178_v60  ;;  %v1223_v60 = vld [vmem:[#allocation7 + $0x2e8] sm:$0xff] }
 0x119   : > { %1650 = vmatpush3.msra.mxu0 %v1162_v61 }
 0x199   : > { %v848_v63 = vpop.f32.mrf.mxu0 }
 0x19b   : > { %v850_v3 = vpop.f32.mrf.mxu0 }
 0x1a8   : > { %v925_v0 = vpop.f32.mrf.mxu1  ;;  %v854_v4 = vpop.f32.mrf.mxu0 }
 0x1a9   : > { %v926_v11 = vadd.f32 %v925_v0, %v848_v63  ;;  %v1207_v63 = vld [vmem:[#allocation7 + $0x268] sm:$0xff] }
 0x1aa   : > { %v927_v5 = vpop.f32.mrf.mxu1  ;;  %v856_v8 = vpop.f32.mrf.mxu0 }
 0x1ab   : > { %v928_v14 = vadd.f32 %v927_v5, %v850_v3 }
 0x1ac   : > { %v931_v9 = vpop.f32.mrf.mxu1 }
 0x1ad   : > { %v932_v20 = vadd.f32 %v931_v9, %v854_v4  ;;  %v1222_v4 = vld [vmem:[#allocation7 + $0x2e0] sm:$0xff]  ;;  %v1205_v9 = vld [vmem:[#allocation7 + $0x258] sm:$0xff] }
 0x1ae   : > { %v933_v18 = vpop.f32.mrf.mxu1 }
 0x1af   : > { %v934_v25 = vadd.f32 %v933_v18, %v856_v8  ;;  %v1201_v18 = vld [vmem:[#allocation7 + $0x238] sm:$0xff] }
 0x1ba   : > { %v1002_v13 = vpop.f32.mrf.mxu0 }
 0x1bb   : > { %v1003_v15 = vadd.f32 %v1002_v13, %v926_v11  ;;  %v1220_v11 = vld [vmem:[#allocation7 + $0x2d0] sm:$0xff]  ;;  %v1219_v13 = vld [vmem:[#allocation7 + $0x2c8] sm:$0xff] }
 0x1bc   : > { %v1004_v19 = vpop.f32.mrf.mxu0 }
 0x1bd   : > { %v1024_v21 = vmul.f32 %v1017_v12, %v1003_v15  ;;  %v1005_v22 = vadd.f32 %v1004_v19, %v928_v14  ;;  %v1203_v14 = vld [vmem:[#allocation7 + $0x248] sm:$0xff]  ;;  %v1218_v15 = vld [vmem:[#allocation7 + $0x2c0] sm:$0xff]  ;;  %v1216_v19 = vld [vmem:[#allocation7 + $0x2b0] sm:$0xff] }
 0x1be   : > { %v1008_v24 = vpop.f32.mrf.mxu0 }
 0x1bf   : > { %v1039_v26 = vadd.f32 %v1032_v16, %v1024_v21  ;;  %v1025_v27 = vmul.f32 %v1021_v17, %v1005_v22  ;;  %v1009_v28 = vadd.f32 %v1008_v24, %v932_v20  ;;  %v1200_v20 = vld [vmem:[#allocation7 + $0x230] sm:$0xff]  ;;  %v1215_v21 = vld [vmem:[#allocation7 + $0x2a8] sm:$0xff]  ;;  %v1198_v24 = vld [vmem:[#allocation7 + $0x220] sm:$0xff] }
 0x1c0   : > { %v1010_v29 = vpop.f32.mrf.mxu0  ;;  %v1199_v22 = vld [vmem:[#allocation7 + $0x228] sm:$0xff] }
 0x1c1   : > { %v1043_v30 = vmax.f32 %v1039_v26, 0.0  ;;  %v1040_v31 = vadd.f32 %v1036_v23, %v1025_v27  ;;  %v1026_v32 = vmul.f32 %v1017_v12, %v1009_v28  ;;  %v1011_v33 = vadd.f32 %v1010_v29, %v934_v25  ;;  %v1204_v12 = vld [vmem:[#allocation7 + $0x250] sm:$0xff]  ;;  %v1213_v25 = vld [vmem:[#allocation7 + $0x298] sm:$0xff] }
 0x1c2   : > { %v1197_v26 = vld [vmem:[#allocation7 + $0x218] sm:$0xff]  ;;  %v1212_v27 = vld [vmem:[#allocation7 + $0x290] sm:$0xff] }
 0x1c3   : > { %v1060_v34 = vrot.slane %v1043_v30, 7  ;;  %v1044_v35 = vmax.f32 %v1040_v31, 0.0  ;;  %v1041_v36 = vadd.f32 %v1032_v16, %v1026_v32  ;;  %v1027_v37 = vmul.f32 %v1021_v17, %v1011_v33  ;;  %v1202_v16 = vld [vmem:[#allocation7 + $0x240] sm:$0xff]  ;;  %v1217_v17 = vld [vmem:[#allocation7 + $0x2b8] sm:$0xff]  ;;  %v1196_v28 = vld [vmem:[#allocation7 + $0x210] sm:$0xff] }
 0x1c4   : > { %v1211_v30 = vld [vmem:[#allocation7 + $0x288] sm:$0xff]  ;;  %v1210_v33 = vld [vmem:[#allocation7 + $0x280] sm:$0xff] }
 0x1c5   : > { %1072 = vst [vmem:[#allocation4 + $0x28] sm:$0xfe] %v1060_v34  ;;  %v1061_v38 = vrot.slane %v1044_v35, 7  ;;  %v1045_v39 = vmax.f32 %v1041_v36, 0.0  ;;  %v1042_v40 = vadd.f32 %v1036_v23, %v1027_v37  ;;  %v1214_v23 = vld [vmem:[#allocation7 + $0x2a0] sm:$0xff]  ;;  %v1195_v32 = vld [vmem:[#allocation7 + $0x208] sm:$0xff] }
 0x1c6   : > { %v1194_v35 = vld [vmem:[#allocation7 + $0x200] sm:$0xff] }
 0x1c7   : > { %1073 = vst [vmem:[#allocation4 + $0x10] sm:$0xfe] %v1061_v38  ;;  %v1062_v41 = vrot.slane %v1045_v39, 7  ;;  %v1046_v42 = vmax.f32 %v1042_v40, 0.0 }
 0x1c9   : > { %v1977_v43 = vsel %vm1059_vm1, %v1060_v34, %v1062_v41  ;;  %1076 = vst [vmem:[#allocation4 + $0x18] sm:$0x1] %v1062_v41  ;;  %v1064_v44 = vrot.slane %v1046_v42, 7 }
 0x1ca   : > { %v1098_v57 = vrot.slane %v1977_v43, 1 }
 0x1cb   : > { %v1979_v45 = vsel %vm1059_vm1, %v1061_v38, %v1064_v44  ;;  %1077 = vst [vmem:[#allocation4 + $0x20] sm:$0x1] %v1064_v44  ;;  %v1117_v38 = vrot.slane %v1977_v43, 2 }
 0x1cc   : > { %v1082_v46 = vld [vmem:[#allocation4 + $0x28] sm:$0xfe]  ;;  %v1101_v54 = vrot.slane %v1979_v45, 1  ;;  %v1120_v62 = vrot.slane %v1979_v45, 2 }
 0x1cd   : > { %v1097_v51 = vrot.slane %v1082_v46, 1  ;;  %v1078_v52 = vld [vmem:[#allocation4 + $0x28] sm:$0xff] }
 0x1ce   : > { %v1079_v48 = vld [vmem:[#allocation4 + $0x10] sm:$0xff]  ;;  %v1086_v29 = vld [vmem:[#allocation4 + $0x28] sm:$0xfc] }
 0x1cf   : > { %v1083_v49 = vld [vmem:[#allocation4 + $0x10] sm:$0xfe]  ;;  %1290 = vmatprep.mubr.f32.mxu1 %v1079_v48  ;;  %v1099_v0 = vsel %vm1096_vm2, %v1097_v51, %v1098_v57  ;;  %v1116_v34 = vrot.slane %v1086_v29, 2 }
 0x1d0   : > { %v1087_v50 = vld [vmem:[#allocation4 + $0x10] sm:$0xfc]  ;;  %v1100_v55 = vrot.slane %v1083_v49, 1  ;;  %1291 = vmatmul.mubr.f32.vlgmr.msra.gmra.mxu1 %v1078_v52  ;;  %v1084_v59 = vld [vmem:[#allocation4 + $0x18] sm:$0x1] }
 0x1d1   : > { %v1119_v58 = vrot.slane %v1087_v50, 2  ;;  %1658 = vmatpush3.msra.mxu1 %v1209_v47  ;;  %1295 = vmatprep.mubr.f32.mxu1 %v1979_v45  ;;  %v1103_v3 = vrot.slane %v1084_v59, 1  ;;  %v1088_v37 = vld [vmem:[#allocation4 + $0x18] sm:$0x3]  ;;  %v1118_v39 = vsel %vm1115_vm3, %v1116_v34, %v1117_v38 }
 0x1d2   : > { %v1102_v61 = vsel %vm1096_vm2, %v1100_v55, %v1101_v54  ;;  %1659 = vmatprep.subr.mxu1 %v1224_v53  ;;  %v1085_v2 = vld [vmem:[#allocation4 + $0x20] sm:$0x1]  ;;  %v1122_v40 = vrot.slane %v1088_v37, 2 }
 0x1d3   : > { %1365 = vmatprep.mubr.f32.mxu0 %v1102_v61  ;;  %1660 = vmatpush3.msra.mxu1 %v1208_v56  ;;  %v1105_v5 = vrot.slane %v1085_v2, 1  ;;  %v1121_v7 = vsel %vm1115_vm3, %v1119_v58, %v1120_v62  ;;  %v1104_v10 = vsel %vm1096_vm2, %v1098_v57, %v1103_v3  ;;  %v1089_v31 = vld [vmem:[#allocation4 + $0x20] sm:$0x3]  ;;  %v1576_v58 = vld [vmem:[%s2020_s8] ss:$0 sm:$0xff] }
 0x1d4   : > { %1366 = vmatmul.mubr.f32.vlgmr.msra.gmra.mxu0 %v1099_v0  ;;  %1661 = vmatprep.subr.mxu1 %v1223_v60  ;;  %v1124_v36 = vrot.slane %v1089_v31, 2  ;;  %v1123_v42 = vsel %vm1115_vm3, %v1117_v38, %v1122_v40  ;;  %v1577_v3 = vld [vmem:[%s2021_s9] ss:$0 sm:$0xff] }
 0x1d5   : > { %1296 = vmatmul.mubr.f32.gmra.mxu1 %v1977_v43  ;;  %v1106_v8 = vsel %vm1096_vm2, %v1101_v54, %v1105_v5 }
 0x1d6   : > { %1662 = vmatpush3.msra.mxu1 %v1207_v63  ;;  %1440 = vmatprep.mubr.f32.mxu1 %v1121_v7  ;;  %v1125_v41 = vsel %vm1115_vm3, %v1120_v62, %v1124_v36 }
 0x1d7   : > { %1663 = vmatprep.subr.mxu1 %v1222_v4  ;;  %1370 = vmatprep.mubr.f32.mxu0 %v1106_v8 }
 0x1d8   : > { %1664 = vmatpush3.msra.mxu1 %v1206_v6  ;;  %1371 = vmatmul.mubr.f32.gmra.mxu0 %v1104_v10 }
 0x1d9   : > { %1665 = vmatprep.subr.mxu1 %v1221_v1 }
 0x1da   : > { %1666 = vmatpush3.msra.mxu1 %v1205_v9 }
 0x1db   : > { %1667 = vmatprep.subr.mxu1 %v1220_v11 }
 0x1dc   : > { %1668 = vmatpush3.msra.mxu1 %v1204_v12 }
 0x1dd   : > { %1669 = vmatprep.subr.mxu1 %v1219_v13 }
 0x1de   : > { %1670 = vmatpush3.msra.mxu1 %v1203_v14 }
 0x1df   : > { %1671 = vmatprep.subr.mxu1 %v1218_v15 }
 0x1e0   : > { %1672 = vmatpush3.msra.mxu1 %v1202_v16 }
 0x1e1   : > { %1673 = vmatprep.subr.mxu1 %v1217_v17 }
 0x1e2   : > { %1674 = vmatpush3.msra.mxu1 %v1201_v18 }
 0x1e3   : > { %1675 = vmatprep.subr.mxu1 %v1216_v19 }
 0x1e4   : > { %1676 = vmatpush3.msra.mxu1 %v1200_v20 }
 0x1e5   : > { %1677 = vmatprep.subr.mxu1 %v1215_v21 }
 0x1e6   : > { %1678 = vmatpush3.msra.mxu1 %v1199_v22 }
 0x1e7   : > { %1679 = vmatprep.subr.mxu1 %v1214_v23 }
 0x1e8   : > { %1680 = vmatpush3.msra.mxu1 %v1198_v24 }
 0x1e9   : > { %1681 = vmatprep.subr.mxu1 %v1213_v25 }
 0x1ea   : > { %1682 = vmatpush3.msra.mxu1 %v1197_v26 }
 0x1eb   : > { %1683 = vmatprep.subr.mxu1 %v1212_v27 }
 0x1ec   : > { %1684 = vmatpush3.msra.mxu1 %v1196_v28 }
 0x1ed   : > { %1685 = vmatprep.subr.mxu1 %v1211_v30 }
 0x1ee   : > { %1686 = vmatpush3.msra.mxu1 %v1195_v32 }
 0x1ef   : > { %1687 = vmatprep.subr.mxu1 %v1210_v33 }
 0x1f0   : > { %1688 = vmatpush3.msra.mxu1 %v1194_v35 }
 0x1f1   : > { %1441 = vmatmul.mubr.f32.vlgmr.msra.gmra.mxu1 %v1118_v39 }
 0x1f2   : > { %1445 = vmatprep.mubr.f32.mxu1 %v1125_v41 }
 0x1f5   : > { %1446 = vmatmul.mubr.f32.gmra.mxu1 %v1123_v42 }
 0x290   : > { %v1613_v44 = vpop.f32.mrf.mxu1 }
 0x292   : > { %v1614_v47 = vpop.f32.mrf.mxu1 }
 0x293   : > { %v1615_v54 = vadd.f32 %v1614_v47, %v1613_v44 }
 0x294   : > { %v1651_v46 = vpop.f32.mrf.mxu0 }
 0x295   : > { %v1616_v43 = vpop.f32.mrf.mxu1 }
 0x296   : > { %v1652_v48 = vpop.f32.mrf.mxu0 }
 0x297   : > { %v1617_v50 = vpop.f32.mrf.mxu1  ;;  %v1653_v51 = vadd.f32 %v1652_v48, %v1651_v46 }
 0x298   : > { %v1654_v49 = vpop.f32.mrf.mxu0  ;;  %v1618_v60 = vadd.f32 %v1617_v50, %v1616_v43 }
 0x299   : > { %v1368_v56 = vadd.f32 %v1653_v51, %v1615_v54 }
 0x29a   : > { %v1655_v52 = vpop.f32.mrf.mxu0 }
 0x29b   : > { %v1656_v45 = vadd.f32 %v1655_v52, %v1654_v49 }
 0x29d   : > { %v1373_v63 = vadd.f32 %v1656_v45, %v1618_v60 }
 0x2b1   : > { %v1689_v53 = vpop.f32.mrf.mxu1 }
 0x2b3   : > { %v1690_v55 = vpop.f32.mrf.mxu1 }
 0x2b4   : > { %v1691_v57 = vadd.f32 %v1690_v55, %v1689_v53 }
 0x2b5   : > { %v1692_v59 = vpop.f32.mrf.mxu1 }
 0x2b6   : > { %v1443_v61 = vadd.f32 %v1691_v57, %v1368_v56 }
 0x2b7   : > { %v1693_v62 = vpop.f32.mrf.mxu1 }
 0x2b8   : > { %v1457_v0 = vmul.f32 %v1576_v58, %v1443_v61  ;;  %v1694_v2 = vadd.f32 %v1693_v62, %v1692_v59 }
 0x2ba   : > { %v1448_v4 = vadd.f32 %v1694_v2, %v1373_v63  ;;  %v1465_v5 = vadd.f32 %v1577_v3, %v1457_v0 }
 0x2bc   : > { %v1458_v6 = vmul.f32 %v1576_v58, %v1448_v4  ;;  %v1467_v1 = vmax.f32 %v1465_v5, 0.0 }
 0x2be   : > { %v1466_v7 = vadd.f32 %v1577_v3, %v1458_v6 }
 0x2c0   : > { %v1468_v8 = vmax.f32 %v1466_v7, 0.0 }
 0x2c2   : > { %v1469_v9 = vadd.f32 %v1468_v8, %v1467_v1 }
 0x2c4   : > { %v1470_v10 = vrot.slane %v1469_v9, 4 }
 0x2c6   : > { %v1471_v11 = vadd.f32 %v1470_v10, %v1469_v9 }
 0x2c8   : > { %v1472_v12 = vrot.slane %v1471_v11, 2 }
 0x2ca   : > { %v1473_v13 = vadd.f32 %v1472_v12, %v1471_v11 }
 0x2cc   : > { %v1474_v14 = vrot.slane %v1473_v13, 1 }
 0x2ce   : > { %v1475_v15 = vadd.f32 %v1474_v14, %v1473_v13 }
 0x2d0   : > { %v1477_v16 = vmul.f32 0.0625, %v1475_v15 }
 0x2d2   : > { %1478 = vst [vmem:[%s385_s29] sm:$0x1] %v1477_v16 }
 0x2d3 PF: > { %s22_s13 = sadd.s32 1, %s1798_s13  }
 0x2d4   : > { %p19_p2 = scmp.ge.s32.totalorder %s22_s13, 4  }
 0x2d6   :  { %21 = sbr.rel (!%p19_p2) target bundleno = 2 (0x2), region = 106 }
 0x2db   :  { %1496 = vsyncpa [#allocation6], 1 }
 0x2dc   :  { %1498 = vsyncpa [#allocation6 + $0x1], 1 }
 0x2dd   :  { %1499 = vsyncpa [#allocation8], 1 }

</bundles_post_ra>
